<compile_context>
chip_gen: v7x
topology: tpu7x:2x2x1
jax: 0.10.0
libtpu: 0.0.40
codegen_flags: <defaults>
</compile_context>

<pallas_src>
import functools

import jax
import jax.numpy as jnp
from jax.experimental import pallas as pl
from jax.experimental.pallas import tpu as pltpu

# ---------------- model hyperparameters (small, ninp == nhid) ----------------
NTOKEN  = 128   # vocabulary size (== lane width)
NINP    = 32    # embedding size
NHID    = 32    # hidden size (== NINP so per-layer weights stack)
NLAYERS = 2
SEQ_LEN = 8
BATCH   = 2


# ------------------------------ Pallas kernel --------------------------------
def fused_rnn_kernel(tok_ref, enc_w_ref, wihT_ref, whhT_ref, b_ref,
                     h0_ref, c0_ref, dec_wT_ref, dec_b_ref,
                     out_ref, hT_ref, cT_ref,
                     *, nlayers, nhid, seq_len, batch):
    """Embedding + stacked-LSTM time loop + decoder, all resident in VMEM.

    tok_ref  : (T*B, 1)   int32  token ids (row t*B + b == token[t, b])
    enc_w    : (V, H)     bf16   embedding table
    wihT     : (L, H, 4H) bf16   input->gates weights, pre-transposed
    whhT     : (L, H, 4H) bf16   hidden->gates weights, pre-transposed
    b        : (L, 1, 4H) f32    combined bias (b_ih + b_hh)
    h0/c0    : (L, B, H)  f32    initial hidden state
    dec_wT   : (H, V)     bf16   decoder weight, pre-transposed
    dec_b    : (1, V)     f32    decoder bias
    out_ref  : (T, B, V)  f32    logits (lane-dense, V == 128)
    hT/cT    : (L, B, H)  f32    final hidden state
    """
    T, B, H = seq_len, batch, nhid
    V = enc_w_ref.shape[0]
    TB = T * B

    # ---- resident weights: loaded once, stay in vregs/VMEM -------------------
    wih  = [wihT_ref[l] for l in range(nlayers)]     # (H, 4H) bf16
    whh  = [whhT_ref[l] for l in range(nlayers)]     # (H, 4H) bf16
    bias = [b_ref[l]    for l in range(nlayers)]     # (1, 4H) f32
    dec_w = dec_wT_ref[...]                          # (H, V)  bf16
    dec_b = dec_b_ref[...]                           # (1, V)  f32

    # ---- embedding lookup as an exact one-hot matmul -------------------------
    tok = tok_ref[...]                                               # (TB, 1) i32
    vocab_iota = jax.lax.broadcasted_iota(jnp.int32, (TB, V), 1)     # (TB, V)
    one_hot = jnp.where(vocab_iota == tok, 1.0, 0.0).astype(jnp.bfloat16)
    emb = jnp.dot(one_hot, enc_w_ref[...],
                  preferred_element_type=jnp.float32)                # (TB, H) f32
    # dropout(emb) == identity in eval mode

    # ---- hoisted layer-0 input projection for ALL timesteps (one MXU pass) ---
    xproj0 = jnp.dot(emb.astype(jnp.bfloat16), wih[0],
                     preferred_element_type=jnp.float32)             # (TB, 4H) f32

    # ---- recurrent state kept as f32 values ----------------------------------
    h = [h0_ref[l] for l in range(nlayers)]                          # (B, H) f32
    c = [c0_ref[l] for l in range(nlayers)]

    # Fully unrolled time loop (T small & static). PyTorch gate order: i, f, g, o.
    for t in range(T):
        x = None
        for l in range(nlayers):
            if l == 0:
                gates = (xproj0[t * B:(t + 1) * B, :]
                         + jnp.dot(h[0].astype(jnp.bfloat16), whh[0],
                                   preferred_element_type=jnp.float32)
                         + bias[0])                                  # (B, 4H)
            else:
                gates = (jnp.dot(x.astype(jnp.bfloat16), wih[l],
                                 preferred_element_type=jnp.float32)
                         + jnp.dot(h[l].astype(jnp.bfloat16), whh[l],
                                   preferred_element_type=jnp.float32)
                         + bias[l])                                  # (B, 4H)
            # Two EUP passes over the full 128-lane tile, then 32-lane slices.
            sg = jax.nn.sigmoid(gates)
            tg = jnp.tanh(gates)
            i_g = sg[:, 0 * H:1 * H]
            f_g = sg[:, 1 * H:2 * H]
            g_g = tg[:, 2 * H:3 * H]
            o_g = sg[:, 3 * H:4 * H]
            c[l] = f_g * c[l] + i_g * g_g        # cell update stays f32 (v5e VPU)
            h[l] = o_g * jnp.tanh(c[l])
            x = h[l]                             # inter-layer dropout == identity
        # Fused decoder for this step; lane-dense (B, V = 128) store.
        out_ref[t] = (jnp.dot(x.astype(jnp.bfloat16), dec_w,
                              preferred_element_type=jnp.float32) + dec_b)

    for l in range(nlayers):
        hT_ref[l] = h[l]
        cT_ref[l] = c[l]


# ------------------------------ Python wrapper --------------------------------
def rnn_model_forward(tokens, hidden, params):
    """Full RNNModel.forward (eval mode). tokens: (T, B) int32."""
    h0, c0 = hidden
    T, B = tokens.shape
    H, V, L = NHID, NTOKEN, NLAYERS

    tok2d = tokens.reshape(T * B, 1).astype(jnp.int32)
    kernel = functools.partial(fused_rnn_kernel, nlayers=L, nhid=H,
                               seq_len=T, batch=B)

    decoded, hT, cT = pl.pallas_call(
        kernel,
        out_shape=(
            jax.ShapeDtypeStruct((T, B, V), jnp.float32),
            jax.ShapeDtypeStruct((L, B, H), jnp.float32),
            jax.ShapeDtypeStruct((L, B, H), jnp.float32),
        ),
        in_specs=[
            pl.BlockSpec((T * B, 1), lambda: (0, 0)),             # tokens
            pl.BlockSpec((V, NINP), lambda: (0, 0)),              # enc_w   (bf16)
            pl.BlockSpec((L, NINP, 4 * H), lambda: (0, 0, 0)),    # wihT    (bf16)
            pl.BlockSpec((L, H, 4 * H), lambda: (0, 0, 0)),       # whhT    (bf16)
            pl.BlockSpec((L, 1, 4 * H), lambda: (0, 0, 0)),       # bias    (f32)
            pl.BlockSpec((L, B, H), lambda: (0, 0, 0)),           # h0      (f32)
            pl.BlockSpec((L, B, H), lambda: (0, 0, 0)),           # c0      (f32)
            pl.BlockSpec((H, V), lambda: (0, 0)),                 # dec_wT  (bf16)
            pl.BlockSpec((1, V), lambda: (0, 0)),                 # dec_b   (f32)
        ],
        out_specs=(
            pl.BlockSpec((T, B, V), lambda: (0, 0, 0)),
            pl.BlockSpec((L, B, H), lambda: (0, 0, 0)),
            pl.BlockSpec((L, B, H), lambda: (0, 0, 0)),
        ),
        compiler_params=pltpu.CompilerParams(
            vmem_limit_bytes=32 * 1024 * 1024),   # working set is tiny; fits every gen
    )(tok2d,
      params["enc_w"].astype(jnp.bfloat16),
      params["wihT"].astype(jnp.bfloat16),
      params["whhT"].astype(jnp.bfloat16),
      params["b"],
      h0, c0,
      params["dec_wT"].astype(jnp.bfloat16),
      params["dec_b"])
    return decoded, (hT, cT)


# --------------------------- pure-JAX reference -------------------------------
def rnn_model_forward_ref(tokens, hidden, params):
    h0, c0 = hidden
    T, B = tokens.shape
    emb = params["enc_w"][tokens]
    h = [h0[l] for l in range(NLAYERS)]
    c = [c0[l] for l in range(NLAYERS)]
    outs = []
    for t in range(T):
        x = emb[t]
        for l in range(NLAYERS):
            gates = x @ params["wihT"][l] + h[l] @ params["whhT"][l] + params["b"][l]
            i = jax.nn.sigmoid(gates[:, 0 * NHID:1 * NHID])
            f = jax.nn.sigmoid(gates[:, 1 * NHID:2 * NHID])
            g = jnp.tanh(gates[:, 2 * NHID:3 * NHID])
            o = jax.nn.sigmoid(gates[:, 3 * NHID:4 * NHID])
            c[l] = f * c[l] + i * g
            h[l] = o * jnp.tanh(c[l])
            x = h[l]
        outs.append(x)
    out = jnp.stack(outs, axis=0)
    decoded = (out.reshape(T * B, NHID) @ params["dec_wT"] + params["dec_b"]
               ).reshape(T, B, NTOKEN)
    return decoded, (jnp.stack(h), jnp.stack(c))


# ----------------------------------- main --------------------------------------
def init_params(key):
    ks = jax.random.split(key, 6)
    initrange = 0.1
    stdv = 1.0 / jnp.sqrt(jnp.float32(NHID))
    enc_w = jax.random.uniform(ks[0], (NTOKEN, NINP), jnp.float32,
                               -initrange, initrange)
    # LSTM weights: PyTorch stores W_ih (4H, in), W_hh (4H, H); we pre-transpose.
    wihT = jax.random.uniform(ks[1], (NLAYERS, NINP, 4 * NHID), jnp.float32,
                              -stdv, stdv)
    whhT = jax.random.uniform(ks[2], (NLAYERS, NHID, 4 * NHID), jnp.float32,
                              -stdv, stdv)
    b_ih = jax.random.uniform(ks[3], (NLAYERS, 1, 4 * NHID), jnp.float32,
                              -stdv, stdv)
    b_hh = jax.random.uniform(ks[4], (NLAYERS, 1, 4 * NHID), jnp.float32,
                              -stdv, stdv)
    dec_w = jax.random.uniform(ks[5], (NTOKEN, NHID), jnp.float32,
                               -initrange, initrange)
    return {
        "enc_w": enc_w,
        "wihT": wihT,
        "whhT": whhT,
        "b": b_ih + b_hh,                        # combined bias
        "dec_wT": dec_w.T,                       # (NHID, NTOKEN)
        "dec_b": jnp.zeros((1, NTOKEN), jnp.float32),
    }


if __name__ == "__main__":
    key = jax.random.PRNGKey(0)
    pkey, tkey = jax.random.split(key)
    params = init_params(pkey)

    tokens = jax.random.randint(tkey, (SEQ_LEN, BATCH), 0, NTOKEN, jnp.int32)
    # init_hidden for LSTM: zeros
    h0 = jnp.zeros((NLAYERS, BATCH, NHID), jnp.float32)
    c0 = jnp.zeros((NLAYERS, BATCH, NHID), jnp.float32)

    fwd = jax.jit(rnn_model_forward)
    decoded, (hT, cT) = fwd(tokens, (h0, c0), params)
    jax.block_until_ready((decoded, hT, cT))

    # correctness check against pure-JAX f32 reference (bf16 matmuls -> 1e-2 tol)
    ref_decoded, (ref_hT, ref_cT) = rnn_model_forward_ref(tokens, (h0, c0), params)
    assert decoded.shape == (SEQ_LEN, BATCH, NTOKEN)
    assert hT.shape == (NLAYERS, BATCH, NHID) and cT.shape == (NLAYERS, BATCH, NHID)
    assert jnp.allclose(decoded, ref_decoded, atol=1e-2, rtol=1e-2)
    assert jnp.allclose(hT, ref_hT, atol=1e-2, rtol=1e-2)
    assert jnp.allclose(cT, ref_cT, atol=1e-2, rtol=1e-2)

    print("KERNEL_OK")
</pallas_src>

<mosaic_0001>
module attributes {stable_mosaic.version = 11 : i64} {
  func.func @fused_rnn_kernel(%arg0: memref<16x1xi32, #tpu.memory_space<vmem>>, %arg1: memref<128x32xbf16, #tpu.memory_space<vmem>>, %arg2: memref<2x32x128xbf16, #tpu.memory_space<vmem>>, %arg3: memref<2x32x128xbf16, #tpu.memory_space<vmem>>, %arg4: memref<2x1x128xf32, #tpu.memory_space<vmem>>, %arg5: memref<2x2x32xf32, #tpu.memory_space<vmem>>, %arg6: memref<2x2x32xf32, #tpu.memory_space<vmem>>, %arg7: memref<32x128xbf16, #tpu.memory_space<vmem>>, %arg8: memref<1x128xf32, #tpu.memory_space<vmem>>, %arg9: memref<8x2x128xf32, #tpu.memory_space<vmem>>, %arg10: memref<2x2x32xf32, #tpu.memory_space<vmem>>, %arg11: memref<2x2x32xf32, #tpu.memory_space<vmem>>) attributes {dimension_semantics = [], scalar_prefetch = 0 : i64, scratch_operands = 0 : i64, tpu.core_type = #tpu.core_type<tc>} {
    %c0 = arith.constant 0 : index
    %c0_0 = arith.constant 0 : index
    %c0_1 = arith.constant 0 : index
    %0 = vector.load %arg2[%c0, %c0_0, %c0_1] : memref<2x32x128xbf16, #tpu.memory_space<vmem>>, vector<1x32x128xbf16>
    %1 = vector.shape_cast %0 : vector<1x32x128xbf16> to vector<32x128xbf16>
    %c1 = arith.constant 1 : index
    %c0_2 = arith.constant 0 : index
    %c0_3 = arith.constant 0 : index
    %2 = vector.load %arg2[%c1, %c0_2, %c0_3] : memref<2x32x128xbf16, #tpu.memory_space<vmem>>, vector<1x32x128xbf16>
    %3 = vector.shape_cast %2 : vector<1x32x128xbf16> to vector<32x128xbf16>
    %c0_4 = arith.constant 0 : index
    %c0_5 = arith.constant 0 : index
    %c0_6 = arith.constant 0 : index
    %4 = vector.load %arg3[%c0_4, %c0_5, %c0_6] : memref<2x32x128xbf16, #tpu.memory_space<vmem>>, vector<1x32x128xbf16>
    %5 = vector.shape_cast %4 : vector<1x32x128xbf16> to vector<32x128xbf16>
    %c1_7 = arith.constant 1 : index
    %c0_8 = arith.constant 0 : index
    %c0_9 = arith.constant 0 : index
    %6 = vector.load %arg3[%c1_7, %c0_8, %c0_9] : memref<2x32x128xbf16, #tpu.memory_space<vmem>>, vector<1x32x128xbf16>
    %7 = vector.shape_cast %6 : vector<1x32x128xbf16> to vector<32x128xbf16>
    %c0_10 = arith.constant 0 : index
    %c0_11 = arith.constant 0 : index
    %c0_12 = arith.constant 0 : index
    %8 = vector.load %arg4[%c0_10, %c0_11, %c0_12] : memref<2x1x128xf32, #tpu.memory_space<vmem>>, vector<1x1x128xf32>
    %9 = vector.shape_cast %8 : vector<1x1x128xf32> to vector<1x128xf32>
    %c1_13 = arith.constant 1 : index
    %c0_14 = arith.constant 0 : index
    %c0_15 = arith.constant 0 : index
    %10 = vector.load %arg4[%c1_13, %c0_14, %c0_15] : memref<2x1x128xf32, #tpu.memory_space<vmem>>, vector<1x1x128xf32>
    %11 = vector.shape_cast %10 : vector<1x1x128xf32> to vector<1x128xf32>
    %c0_16 = arith.constant 0 : index
    %c0_17 = arith.constant 0 : index
    %12 = vector.load %arg7[%c0_16, %c0_17] : memref<32x128xbf16, #tpu.memory_space<vmem>>, vector<32x128xbf16>
    %c0_18 = arith.constant 0 : index
    %c0_19 = arith.constant 0 : index
    %13 = vector.load %arg8[%c0_18, %c0_19] : memref<1x128xf32, #tpu.memory_space<vmem>>, vector<1x128xf32>
    %c0_20 = arith.constant 0 : index
    %c0_21 = arith.constant 0 : index
    %14 = vector.load %arg0[%c0_20, %c0_21] : memref<16x1xi32, #tpu.memory_space<vmem>>, vector<16x1xi32>
    %15 = tpu.iota {dimensions = array<i32: 1>} : vector<16x128xi32>
    %16 = vector.broadcast %14 : vector<16x1xi32> to vector<16x128xi32>
    %17 = arith.cmpi eq, %15, %16 : vector<16x128xi32>
    %cst = arith.constant 1.000000e+00 : f32
    %cst_22 = arith.constant 0.000000e+00 : f32
    %18 = vector.broadcast %cst : f32 to vector<16x128xf32>
    %19 = vector.broadcast %cst_22 : f32 to vector<16x128xf32>
    %20 = arith.select %17, %18, %19 : vector<16x128xi1>, vector<16x128xf32>
    %21 = arith.truncf %20 : vector<16x128xf32> to vector<16x128xbf16>
    %c0_23 = arith.constant 0 : index
    %c0_24 = arith.constant 0 : index
    %22 = vector.load %arg1[%c0_23, %c0_24] : memref<128x32xbf16, #tpu.memory_space<vmem>>, vector<128x32xbf16>
    %cst_25 = arith.constant dense<0.000000e+00> : vector<16x32xf32>
    %23 = tpu.matmul %21, %22, %cst_25 {dimension_numbers = #tpu.dot_dimension_numbers<[1], [0], [0], [1], [0, 0, 1, 1], [], []>} : vector<16x128xbf16>, vector<128x32xbf16>, vector<16x32xf32> -> vector<16x32xf32>
    %24 = arith.truncf %23 : vector<16x32xf32> to vector<16x32xbf16>
    %cst_26 = arith.constant dense<0.000000e+00> : vector<16x128xf32>
    %25 = tpu.matmul %24, %1, %cst_26 {dimension_numbers = #tpu.dot_dimension_numbers<[1], [0], [0], [1], [0, 0, 1, 1], [], []>} : vector<16x32xbf16>, vector<32x128xbf16>, vector<16x128xf32> -> vector<16x128xf32>
    %c0_27 = arith.constant 0 : index
    %c0_28 = arith.constant 0 : index
    %c0_29 = arith.constant 0 : index
    %26 = vector.load %arg5[%c0_27, %c0_28, %c0_29] : memref<2x2x32xf32, #tpu.memory_space<vmem>>, vector<1x2x32xf32>
    %27 = vector.shape_cast %26 : vector<1x2x32xf32> to vector<2x32xf32>
    %c1_30 = arith.constant 1 : index
    %c0_31 = arith.constant 0 : index
    %c0_32 = arith.constant 0 : index
    %28 = vector.load %arg5[%c1_30, %c0_31, %c0_32] : memref<2x2x32xf32, #tpu.memory_space<vmem>>, vector<1x2x32xf32>
    %29 = vector.shape_cast %28 : vector<1x2x32xf32> to vector<2x32xf32>
    %c0_33 = arith.constant 0 : index
    %c0_34 = arith.constant 0 : index
    %c0_35 = arith.constant 0 : index
    %30 = vector.load %arg6[%c0_33, %c0_34, %c0_35] : memref<2x2x32xf32, #tpu.memory_space<vmem>>, vector<1x2x32xf32>
    %31 = vector.shape_cast %30 : vector<1x2x32xf32> to vector<2x32xf32>
    %c1_36 = arith.constant 1 : index
    %c0_37 = arith.constant 0 : index
    %c0_38 = arith.constant 0 : index
    %32 = vector.load %arg6[%c1_36, %c0_37, %c0_38] : memref<2x2x32xf32, #tpu.memory_space<vmem>>, vector<1x2x32xf32>
    %33 = vector.shape_cast %32 : vector<1x2x32xf32> to vector<2x32xf32>
    %34 = vector.extract_strided_slice %25 {offsets = [0, 0], sizes = [2, 128], strides = [1, 1]} : vector<16x128xf32> to vector<2x128xf32>
    %35 = arith.truncf %27 : vector<2x32xf32> to vector<2x32xbf16>
    %cst_39 = arith.constant dense<0.000000e+00> : vector<2x128xf32>
    %36 = tpu.matmul %35, %5, %cst_39 {dimension_numbers = #tpu.dot_dimension_numbers<[1], [0], [0], [1], [0, 0, 1, 1], [], []>} : vector<2x32xbf16>, vector<32x128xbf16>, vector<2x128xf32> -> vector<2x128xf32>
    %37 = arith.addf %34, %36 : vector<2x128xf32>
    %38 = vector.broadcast %9 : vector<1x128xf32> to vector<2x128xf32>
    %39 = arith.addf %37, %38 : vector<2x128xf32>
    %40 = arith.negf %39 : vector<2x128xf32>
    %41 = math.exp %40 : vector<2x128xf32>
    %cst_40 = arith.constant 1.000000e+00 : f32
    %42 = vector.broadcast %cst_40 : f32 to vector<2x128xf32>
    %43 = arith.addf %42, %41 : vector<2x128xf32>
    %44 = arith.divf %42, %43 : vector<2x128xf32>
    %45 = math.tanh %39 : vector<2x128xf32>
    %46 = vector.extract_strided_slice %44 {offsets = [0, 0], sizes = [2, 32], strides = [1, 1]} : vector<2x128xf32> to vector<2x32xf32>
    %47 = vector.extract_strided_slice %44 {offsets = [0, 32], sizes = [2, 32], strides = [1, 1]} : vector<2x128xf32> to vector<2x32xf32>
    %48 = vector.extract_strided_slice %45 {offsets = [0, 64], sizes = [2, 32], strides = [1, 1]} : vector<2x128xf32> to vector<2x32xf32>
    %49 = vector.extract_strided_slice %44 {offsets = [0, 96], sizes = [2, 32], strides = [1, 1]} : vector<2x128xf32> to vector<2x32xf32>
    %50 = arith.mulf %47, %31 : vector<2x32xf32>
    %51 = arith.mulf %46, %48 : vector<2x32xf32>
    %52 = arith.addf %50, %51 : vector<2x32xf32>
    %53 = math.tanh %52 : vector<2x32xf32>
    %54 = arith.mulf %49, %53 : vector<2x32xf32>
    %55 = arith.truncf %54 : vector<2x32xf32> to vector<2x32xbf16>
    %cst_41 = arith.constant dense<0.000000e+00> : vector<2x128xf32>
    %56 = tpu.matmul %55, %3, %cst_41 {dimension_numbers = #tpu.dot_dimension_numbers<[1], [0], [0], [1], [0, 0, 1, 1], [], []>} : vector<2x32xbf16>, vector<32x128xbf16>, vector<2x128xf32> -> vector<2x128xf32>
    %57 = arith.truncf %29 : vector<2x32xf32> to vector<2x32xbf16>
    %cst_42 = arith.constant dense<0.000000e+00> : vector<2x128xf32>
    %58 = tpu.matmul %57, %7, %cst_42 {dimension_numbers = #tpu.dot_dimension_numbers<[1], [0], [0], [1], [0, 0, 1, 1], [], []>} : vector<2x32xbf16>, vector<32x128xbf16>, vector<2x128xf32> -> vector<2x128xf32>
    %59 = arith.addf %56, %58 : vector<2x128xf32>
    %60 = vector.broadcast %11 : vector<1x128xf32> to vector<2x128xf32>
    %61 = arith.addf %59, %60 : vector<2x128xf32>
    %62 = arith.negf %61 : vector<2x128xf32>
    %63 = math.exp %62 : vector<2x128xf32>
    %cst_43 = arith.constant 1.000000e+00 : f32
    %64 = vector.broadcast %cst_43 : f32 to vector<2x128xf32>
    %65 = arith.addf %64, %63 : vector<2x128xf32>
    %66 = arith.divf %64, %65 : vector<2x128xf32>
    %67 = math.tanh %61 : vector<2x128xf32>
    %68 = vector.extract_strided_slice %66 {offsets = [0, 0], sizes = [2, 32], strides = [1, 1]} : vector<2x128xf32> to vector<2x32xf32>
    %69 = vector.extract_strided_slice %66 {offsets = [0, 32], sizes = [2, 32], strides = [1, 1]} : vector<2x128xf32> to vector<2x32xf32>
    %70 = vector.extract_strided_slice %67 {offsets = [0, 64], sizes = [2, 32], strides = [1, 1]} : vector<2x128xf32> to vector<2x32xf32>
    %71 = vector.extract_strided_slice %66 {offsets = [0, 96], sizes = [2, 32], strides = [1, 1]} : vector<2x128xf32> to vector<2x32xf32>
    %72 = arith.mulf %69, %33 : vector<2x32xf32>
    %73 = arith.mulf %68, %70 : vector<2x32xf32>
    %74 = arith.addf %72, %73 : vector<2x32xf32>
    %75 = math.tanh %74 : vector<2x32xf32>
    %76 = arith.mulf %71, %75 : vector<2x32xf32>
    %77 = arith.truncf %76 : vector<2x32xf32> to vector<2x32xbf16>
    %cst_44 = arith.constant dense<0.000000e+00> : vector<2x128xf32>
    %78 = tpu.matmul %77, %12, %cst_44 {dimension_numbers = #tpu.dot_dimension_numbers<[1], [0], [0], [1], [0, 0, 1, 1], [], []>} : vector<2x32xbf16>, vector<32x128xbf16>, vector<2x128xf32> -> vector<2x128xf32>
    %79 = vector.broadcast %13 : vector<1x128xf32> to vector<2x128xf32>
    %80 = arith.addf %78, %79 : vector<2x128xf32>
    %c0_45 = arith.constant 0 : index
    %c0_46 = arith.constant 0 : index
    %c0_47 = arith.constant 0 : index
    %81 = vector.load %arg9[%c0_45, %c0_46, %c0_47] : memref<8x2x128xf32, #tpu.memory_space<vmem>>, vector<1x2x128xf32>
    %82 = vector.shape_cast %81 : vector<1x2x128xf32> to vector<2x128xf32>
    %83 = vector.shape_cast %80 : vector<2x128xf32> to vector<1x2x128xf32>
    tpu.vector_store %arg9[%c0_45, %c0_46, %c0_47], %83 {strides = array<i32>} : memref<8x2x128xf32, #tpu.memory_space<vmem>>, vector<1x2x128xf32>,
    %84 = vector.extract_strided_slice %25 {offsets = [2, 0], sizes = [2, 128], strides = [1, 1]} : vector<16x128xf32> to vector<2x128xf32>
    %85 = arith.truncf %54 : vector<2x32xf32> to vector<2x32xbf16>
    %cst_48 = arith.constant dense<0.000000e+00> : vector<2x128xf32>
    %86 = tpu.matmul %85, %5, %cst_48 {dimension_numbers = #tpu.dot_dimension_numbers<[1], [0], [0], [1], [0, 0, 1, 1], [], []>} : vector<2x32xbf16>, vector<32x128xbf16>, vector<2x128xf32> -> vector<2x128xf32>
    %87 = arith.addf %84, %86 : vector<2x128xf32>
    %88 = vector.broadcast %9 : vector<1x128xf32> to vector<2x128xf32>
    %89 = arith.addf %87, %88 : vector<2x128xf32>
    %90 = arith.negf %89 : vector<2x128xf32>
    %91 = math.exp %90 : vector<2x128xf32>
    %cst_49 = arith.constant 1.000000e+00 : f32
    %92 = vector.broadcast %cst_49 : f32 to vector<2x128xf32>
    %93 = arith.addf %92, %91 : vector<2x128xf32>
    %94 = arith.divf %92, %93 : vector<2x128xf32>
    %95 = math.tanh %89 : vector<2x128xf32>
    %96 = vector.extract_strided_slice %94 {offsets = [0, 0], sizes = [2, 32], strides = [1, 1]} : vector<2x128xf32> to vector<2x32xf32>
    %97 = vector.extract_strided_slice %94 {offsets = [0, 32], sizes = [2, 32], strides = [1, 1]} : vector<2x128xf32> to vector<2x32xf32>
    %98 = vector.extract_strided_slice %95 {offsets = [0, 64], sizes = [2, 32], strides = [1, 1]} : vector<2x128xf32> to vector<2x32xf32>
    %99 = vector.extract_strided_slice %94 {offsets = [0, 96], sizes = [2, 32], strides = [1, 1]} : vector<2x128xf32> to vector<2x32xf32>
    %100 = arith.mulf %97, %52 : vector<2x32xf32>
    %101 = arith.mulf %96, %98 : vector<2x32xf32>
    %102 = arith.addf %100, %101 : vector<2x32xf32>
    %103 = math.tanh %102 : vector<2x32xf32>
    %104 = arith.mulf %99, %103 : vector<2x32xf32>
    %105 = arith.truncf %104 : vector<2x32xf32> to vector<2x32xbf16>
    %cst_50 = arith.constant dense<0.000000e+00> : vector<2x128xf32>
    %106 = tpu.matmul %105, %3, %cst_50 {dimension_numbers = #tpu.dot_dimension_numbers<[1], [0], [0], [1], [0, 0, 1, 1], [], []>} : vector<2x32xbf16>, vector<32x128xbf16>, vector<2x128xf32> -> vector<2x128xf32>
    %107 = arith.truncf %76 : vector<2x32xf32> to vector<2x32xbf16>
    %cst_51 = arith.constant dense<0.000000e+00> : vector<2x128xf32>
    %108 = tpu.matmul %107, %7, %cst_51 {dimension_numbers = #tpu.dot_dimension_numbers<[1], [0], [0], [1], [0, 0, 1, 1], [], []>} : vector<2x32xbf16>, vector<32x128xbf16>, vector<2x128xf32> -> vector<2x128xf32>
    %109 = arith.addf %106, %108 : vector<2x128xf32>
    %110 = vector.broadcast %11 : vector<1x128xf32> to vector<2x128xf32>
    %111 = arith.addf %109, %110 : vector<2x128xf32>
    %112 = arith.negf %111 : vector<2x128xf32>
    %113 = math.exp %112 : vector<2x128xf32>
    %cst_52 = arith.constant 1.000000e+00 : f32
    %114 = vector.broadcast %cst_52 : f32 to vector<2x128xf32>
    %115 = arith.addf %114, %113 : vector<2x128xf32>
    %116 = arith.divf %114, %115 : vector<2x128xf32>
    %117 = math.tanh %111 : vector<2x128xf32>
    %118 = vector.extract_strided_slice %116 {offsets = [0, 0], sizes = [2, 32], strides = [1, 1]} : vector<2x128xf32> to vector<2x32xf32>
    %119 = vector.extract_strided_slice %116 {offsets = [0, 32], sizes = [2, 32], strides = [1, 1]} : vector<2x128xf32> to vector<2x32xf32>
    %120 = vector.extract_strided_slice %117 {offsets = [0, 64], sizes = [2, 32], strides = [1, 1]} : vector<2x128xf32> to vector<2x32xf32>
    %121 = vector.extract_strided_slice %116 {offsets = [0, 96], sizes = [2, 32], strides = [1, 1]} : vector<2x128xf32> to vector<2x32xf32>
    %122 = arith.mulf %119, %74 : vector<2x32xf32>
    %123 = arith.mulf %118, %120 : vector<2x32xf32>
    %124 = arith.addf %122, %123 : vector<2x32xf32>
    %125 = math.tanh %124 : vector<2x32xf32>
    %126 = arith.mulf %121, %125 : vector<2x32xf32>
    %127 = arith.truncf %126 : vector<2x32xf32> to vector<2x32xbf16>
    %cst_53 = arith.constant dense<0.000000e+00> : vector<2x128xf32>
    %128 = tpu.matmul %127, %12, %cst_53 {dimension_numbers = #tpu.dot_dimension_numbers<[1], [0], [0], [1], [0, 0, 1, 1], [], []>} : vector<2x32xbf16>, vector<32x128xbf16>, vector<2x128xf32> -> vector<2x128xf32>
    %129 = vector.broadcast %13 : vector<1x128xf32> to vector<2x128xf32>
    %130 = arith.addf %128, %129 : vector<2x128xf32>
    %c1_54 = arith.constant 1 : index
    %c0_55 = arith.constant 0 : index
    %c0_56 = arith.constant 0 : index
    %131 = vector.load %arg9[%c1_54, %c0_55, %c0_56] : memref<8x2x128xf32, #tpu.memory_space<vmem>>, vector<1x2x128xf32>
    %132 = vector.shape_cast %131 : vector<1x2x128xf32> to vector<2x128xf32>
    %133 = vector.shape_cast %130 : vector<2x128xf32> to vector<1x2x128xf32>
    tpu.vector_store %arg9[%c1_54, %c0_55, %c0_56], %133 {strides = array<i32>} : memref<8x2x128xf32, #tpu.memory_space<vmem>>, vector<1x2x128xf32>,
    %134 = vector.extract_strided_slice %25 {offsets = [4, 0], sizes = [2, 128], strides = [1, 1]} : vector<16x128xf32> to vector<2x128xf32>
    %135 = arith.truncf %104 : vector<2x32xf32> to vector<2x32xbf16>
    %cst_57 = arith.constant dense<0.000000e+00> : vector<2x128xf32>
    %136 = tpu.matmul %135, %5, %cst_57 {dimension_numbers = #tpu.dot_dimension_numbers<[1], [0], [0], [1], [0, 0, 1, 1], [], []>} : vector<2x32xbf16>, vector<32x128xbf16>, vector<2x128xf32> -> vector<2x128xf32>
    %137 = arith.addf %134, %136 : vector<2x128xf32>
    %138 = vector.broadcast %9 : vector<1x128xf32> to vector<2x128xf32>
    %139 = arith.addf %137, %138 : vector<2x128xf32>
    %140 = arith.negf %139 : vector<2x128xf32>
    %141 = math.exp %140 : vector<2x128xf32>
    %cst_58 = arith.constant 1.000000e+00 : f32
    %142 = vector.broadcast %cst_58 : f32 to vector<2x128xf32>
    %143 = arith.addf %142, %141 : vector<2x128xf32>
    %144 = arith.divf %142, %143 : vector<2x128xf32>
    %145 = math.tanh %139 : vector<2x128xf32>
    %146 = vector.extract_strided_slice %144 {offsets = [0, 0], sizes = [2, 32], strides = [1, 1]} : vector<2x128xf32> to vector<2x32xf32>
    %147 = vector.extract_strided_slice %144 {offsets = [0, 32], sizes = [2, 32], strides = [1, 1]} : vector<2x128xf32> to vector<2x32xf32>
    %148 = vector.extract_strided_slice %145 {offsets = [0, 64], sizes = [2, 32], strides = [1, 1]} : vector<2x128xf32> to vector<2x32xf32>
    %149 = vector.extract_strided_slice %144 {offsets = [0, 96], sizes = [2, 32], strides = [1, 1]} : vector<2x128xf32> to vector<2x32xf32>
    %150 = arith.mulf %147, %102 : vector<2x32xf32>
    %151 = arith.mulf %146, %148 : vector<2x32xf32>
    %152 = arith.addf %150, %151 : vector<2x32xf32>
    %153 = math.tanh %152 : vector<2x32xf32>
    %154 = arith.mulf %149, %153 : vector<2x32xf32>
    %155 = arith.truncf %154 : vector<2x32xf32> to vector<2x32xbf16>
    %cst_59 = arith.constant dense<0.000000e+00> : vector<2x128xf32>
    %156 = tpu.matmul %155, %3, %cst_59 {dimension_numbers = #tpu.dot_dimension_numbers<[1], [0], [0], [1], [0, 0, 1, 1], [], []>} : vector<2x32xbf16>, vector<32x128xbf16>, vector<2x128xf32> -> vector<2x128xf32>
    %157 = arith.truncf %126 : vector<2x32xf32> to vector<2x32xbf16>
    %cst_60 = arith.constant dense<0.000000e+00> : vector<2x128xf32>
    %158 = tpu.matmul %157, %7, %cst_60 {dimension_numbers = #tpu.dot_dimension_numbers<[1], [0], [0], [1], [0, 0, 1, 1], [], []>} : vector<2x32xbf16>, vector<32x128xbf16>, vector<2x128xf32> -> vector<2x128xf32>
    %159 = arith.addf %156, %158 : vector<2x128xf32>
    %160 = vector.broadcast %11 : vector<1x128xf32> to vector<2x128xf32>
    %161 = arith.addf %159, %160 : vector<2x128xf32>
    %162 = arith.negf %161 : vector<2x128xf32>
    %163 = math.exp %162 : vector<2x128xf32>
    %cst_61 = arith.constant 1.000000e+00 : f32
    %164 = vector.broadcast %cst_61 : f32 to vector<2x128xf32>
    %165 = arith.addf %164, %163 : vector<2x128xf32>
    %166 = arith.divf %164, %165 : vector<2x128xf32>
    %167 = math.tanh %161 : vector<2x128xf32>
    %168 = vector.extract_strided_slice %166 {offsets = [0, 0], sizes = [2, 32], strides = [1, 1]} : vector<2x128xf32> to vector<2x32xf32>
    %169 = vector.extract_strided_slice %166 {offsets = [0, 32], sizes = [2, 32], strides = [1, 1]} : vector<2x128xf32> to vector<2x32xf32>
    %170 = vector.extract_strided_slice %167 {offsets = [0, 64], sizes = [2, 32], strides = [1, 1]} : vector<2x128xf32> to vector<2x32xf32>
    %171 = vector.extract_strided_slice %166 {offsets = [0, 96], sizes = [2, 32], strides = [1, 1]} : vector<2x128xf32> to vector<2x32xf32>
    %172 = arith.mulf %169, %124 : vector<2x32xf32>
    %173 = arith.mulf %168, %170 : vector<2x32xf32>
    %174 = arith.addf %172, %173 : vector<2x32xf32>
    %175 = math.tanh %174 : vector<2x32xf32>
    %176 = arith.mulf %171, %175 : vector<2x32xf32>
    %177 = arith.truncf %176 : vector<2x32xf32> to vector<2x32xbf16>
    %cst_62 = arith.constant dense<0.000000e+00> : vector<2x128xf32>
    %178 = tpu.matmul %177, %12, %cst_62 {dimension_numbers = #tpu.dot_dimension_numbers<[1], [0], [0], [1], [0, 0, 1, 1], [], []>} : vector<2x32xbf16>, vector<32x128xbf16>, vector<2x128xf32> -> vector<2x128xf32>
    %179 = vector.broadcast %13 : vector<1x128xf32> to vector<2x128xf32>
    %180 = arith.addf %178, %179 : vector<2x128xf32>
    %c2 = arith.constant 2 : index
    %c0_63 = arith.constant 0 : index
    %c0_64 = arith.constant 0 : index
    %181 = vector.load %arg9[%c2, %c0_63, %c0_64] : memref<8x2x128xf32, #tpu.memory_space<vmem>>, vector<1x2x128xf32>
    %182 = vector.shape_cast %181 : vector<1x2x128xf32> to vector<2x128xf32>
    %183 = vector.shape_cast %180 : vector<2x128xf32> to vector<1x2x128xf32>
    tpu.vector_store %arg9[%c2, %c0_63, %c0_64], %183 {strides = array<i32>} : memref<8x2x128xf32, #tpu.memory_space<vmem>>, vector<1x2x128xf32>,
    %184 = vector.extract_strided_slice %25 {offsets = [6, 0], sizes = [2, 128], strides = [1, 1]} : vector<16x128xf32> to vector<2x128xf32>
    %185 = arith.truncf %154 : vector<2x32xf32> to vector<2x32xbf16>
    %cst_65 = arith.constant dense<0.000000e+00> : vector<2x128xf32>
    %186 = tpu.matmul %185, %5, %cst_65 {dimension_numbers = #tpu.dot_dimension_numbers<[1], [0], [0], [1], [0, 0, 1, 1], [], []>} : vector<2x32xbf16>, vector<32x128xbf16>, vector<2x128xf32> -> vector<2x128xf32>
    %187 = arith.addf %184, %186 : vector<2x128xf32>
    %188 = vector.broadcast %9 : vector<1x128xf32> to vector<2x128xf32>
    %189 = arith.addf %187, %188 : vector<2x128xf32>
    %190 = arith.negf %189 : vector<2x128xf32>
    %191 = math.exp %190 : vector<2x128xf32>
    %cst_66 = arith.constant 1.000000e+00 : f32
    %192 = vector.broadcast %cst_66 : f32 to vector<2x128xf32>
    %193 = arith.addf %192, %191 : vector<2x128xf32>
    %194 = arith.divf %192, %193 : vector<2x128xf32>
    %195 = math.tanh %189 : vector<2x128xf32>
    %196 = vector.extract_strided_slice %194 {offsets = [0, 0], sizes = [2, 32], strides = [1, 1]} : vector<2x128xf32> to vector<2x32xf32>
    %197 = vector.extract_strided_slice %194 {offsets = [0, 32], sizes = [2, 32], strides = [1, 1]} : vector<2x128xf32> to vector<2x32xf32>
    %198 = vector.extract_strided_slice %195 {offsets = [0, 64], sizes = [2, 32], strides = [1, 1]} : vector<2x128xf32> to vector<2x32xf32>
    %199 = vector.extract_strided_slice %194 {offsets = [0, 96], sizes = [2, 32], strides = [1, 1]} : vector<2x128xf32> to vector<2x32xf32>
    %200 = arith.mulf %197, %152 : vector<2x32xf32>
    %201 = arith.mulf %196, %198 : vector<2x32xf32>
    %202 = arith.addf %200, %201 : vector<2x32xf32>
    %203 = math.tanh %202 : vector<2x32xf32>
    %204 = arith.mulf %199, %203 : vector<2x32xf32>
    %205 = arith.truncf %204 : vector<2x32xf32> to vector<2x32xbf16>
    %cst_67 = arith.constant dense<0.000000e+00> : vector<2x128xf32>
    %206 = tpu.matmul %205, %3, %cst_67 {dimension_numbers = #tpu.dot_dimension_numbers<[1], [0], [0], [1], [0, 0, 1, 1], [], []>} : vector<2x32xbf16>, vector<32x128xbf16>, vector<2x128xf32> -> vector<2x128xf32>
    %207 = arith.truncf %176 : vector<2x32xf32> to vector<2x32xbf16>
    %cst_68 = arith.constant dense<0.000000e+00> : vector<2x128xf32>
    %208 = tpu.matmul %207, %7, %cst_68 {dimension_numbers = #tpu.dot_dimension_numbers<[1], [0], [0], [1], [0, 0, 1, 1], [], []>} : vector<2x32xbf16>, vector<32x128xbf16>, vector<2x128xf32> -> vector<2x128xf32>
    %209 = arith.addf %206, %208 : vector<2x128xf32>
    %210 = vector.broadcast %11 : vector<1x128xf32> to vector<2x128xf32>
    %211 = arith.addf %209, %210 : vector<2x128xf32>
    %212 = arith.negf %211 : vector<2x128xf32>
    %213 = math.exp %212 : vector<2x128xf32>
    %cst_69 = arith.constant 1.000000e+00 : f32
    %214 = vector.broadcast %cst_69 : f32 to vector<2x128xf32>
    %215 = arith.addf %214, %213 : vector<2x128xf32>
    %216 = arith.divf %214, %215 : vector<2x128xf32>
    %217 = math.tanh %211 : vector<2x128xf32>
    %218 = vector.extract_strided_slice %216 {offsets = [0, 0], sizes = [2, 32], strides = [1, 1]} : vector<2x128xf32> to vector<2x32xf32>
    %219 = vector.extract_strided_slice %216 {offsets = [0, 32], sizes = [2, 32], strides = [1, 1]} : vector<2x128xf32> to vector<2x32xf32>
    %220 = vector.extract_strided_slice %217 {offsets = [0, 64], sizes = [2, 32], strides = [1, 1]} : vector<2x128xf32> to vector<2x32xf32>
    %221 = vector.extract_strided_slice %216 {offsets = [0, 96], sizes = [2, 32], strides = [1, 1]} : vector<2x128xf32> to vector<2x32xf32>
    %222 = arith.mulf %219, %174 : vector<2x32xf32>
    %223 = arith.mulf %218, %220 : vector<2x32xf32>
    %224 = arith.addf %222, %223 : vector<2x32xf32>
    %225 = math.tanh %224 : vector<2x32xf32>
    %226 = arith.mulf %221, %225 : vector<2x32xf32>
    %227 = arith.truncf %226 : vector<2x32xf32> to vector<2x32xbf16>
    %cst_70 = arith.constant dense<0.000000e+00> : vector<2x128xf32>
    %228 = tpu.matmul %227, %12, %cst_70 {dimension_numbers = #tpu.dot_dimension_numbers<[1], [0], [0], [1], [0, 0, 1, 1], [], []>} : vector<2x32xbf16>, vector<32x128xbf16>, vector<2x128xf32> -> vector<2x128xf32>
    %229 = vector.broadcast %13 : vector<1x128xf32> to vector<2x128xf32>
    %230 = arith.addf %228, %229 : vector<2x128xf32>
    %c3 = arith.constant 3 : index
    %c0_71 = arith.constant 0 : index
    %c0_72 = arith.constant 0 : index
    %231 = vector.load %arg9[%c3, %c0_71, %c0_72] : memref<8x2x128xf32, #tpu.memory_space<vmem>>, vector<1x2x128xf32>
    %232 = vector.shape_cast %231 : vector<1x2x128xf32> to vector<2x128xf32>
    %233 = vector.shape_cast %230 : vector<2x128xf32> to vector<1x2x128xf32>
    tpu.vector_store %arg9[%c3, %c0_71, %c0_72], %233 {strides = array<i32>} : memref<8x2x128xf32, #tpu.memory_space<vmem>>, vector<1x2x128xf32>,
    %234 = vector.extract_strided_slice %25 {offsets = [8, 0], sizes = [2, 128], strides = [1, 1]} : vector<16x128xf32> to vector<2x128xf32>
    %235 = arith.truncf %204 : vector<2x32xf32> to vector<2x32xbf16>
    %cst_73 = arith.constant dense<0.000000e+00> : vector<2x128xf32>
    %236 = tpu.matmul %235, %5, %cst_73 {dimension_numbers = #tpu.dot_dimension_numbers<[1], [0], [0], [1], [0, 0, 1, 1], [], []>} : vector<2x32xbf16>, vector<32x128xbf16>, vector<2x128xf32> -> vector<2x128xf32>
    %237 = arith.addf %234, %236 : vector<2x128xf32>
    %238 = vector.broadcast %9 : vector<1x128xf32> to vector<2x128xf32>
    %239 = arith.addf %237, %238 : vector<2x128xf32>
    %240 = arith.negf %239 : vector<2x128xf32>
    %241 = math.exp %240 : vector<2x128xf32>
    %cst_74 = arith.constant 1.000000e+00 : f32
    %242 = vector.broadcast %cst_74 : f32 to vector<2x128xf32>
    %243 = arith.addf %242, %241 : vector<2x128xf32>
    %244 = arith.divf %242, %243 : vector<2x128xf32>
    %245 = math.tanh %239 : vector<2x128xf32>
    %246 = vector.extract_strided_slice %244 {offsets = [0, 0], sizes = [2, 32], strides = [1, 1]} : vector<2x128xf32> to vector<2x32xf32>
    %247 = vector.extract_strided_slice %244 {offsets = [0, 32], sizes = [2, 32], strides = [1, 1]} : vector<2x128xf32> to vector<2x32xf32>
    %248 = vector.extract_strided_slice %245 {offsets = [0, 64], sizes = [2, 32], strides = [1, 1]} : vector<2x128xf32> to vector<2x32xf32>
    %249 = vector.extract_strided_slice %244 {offsets = [0, 96], sizes = [2, 32], strides = [1, 1]} : vector<2x128xf32> to vector<2x32xf32>
    %250 = arith.mulf %247, %202 : vector<2x32xf32>
    %251 = arith.mulf %246, %248 : vector<2x32xf32>
    %252 = arith.addf %250, %251 : vector<2x32xf32>
    %253 = math.tanh %252 : vector<2x32xf32>
    %254 = arith.mulf %249, %253 : vector<2x32xf32>
    %255 = arith.truncf %254 : vector<2x32xf32> to vector<2x32xbf16>
    %cst_75 = arith.constant dense<0.000000e+00> : vector<2x128xf32>
    %256 = tpu.matmul %255, %3, %cst_75 {dimension_numbers = #tpu.dot_dimension_numbers<[1], [0], [0], [1], [0, 0, 1, 1], [], []>} : vector<2x32xbf16>, vector<32x128xbf16>, vector<2x128xf32> -> vector<2x128xf32>
    %257 = arith.truncf %226 : vector<2x32xf32> to vector<2x32xbf16>
    %cst_76 = arith.constant dense<0.000000e+00> : vector<2x128xf32>
    %258 = tpu.matmul %257, %7, %cst_76 {dimension_numbers = #tpu.dot_dimension_numbers<[1], [0], [0], [1], [0, 0, 1, 1], [], []>} : vector<2x32xbf16>, vector<32x128xbf16>, vector<2x128xf32> -> vector<2x128xf32>
    %259 = arith.addf %256, %258 : vector<2x128xf32>
    %260 = vector.broadcast %11 : vector<1x128xf32> to vector<2x128xf32>
    %261 = arith.addf %259, %260 : vector<2x128xf32>
    %262 = arith.negf %261 : vector<2x128xf32>
    %263 = math.exp %262 : vector<2x128xf32>
    %cst_77 = arith.constant 1.000000e+00 : f32
    %264 = vector.broadcast %cst_77 : f32 to vector<2x128xf32>
    %265 = arith.addf %264, %263 : vector<2x128xf32>
    %266 = arith.divf %264, %265 : vector<2x128xf32>
    %267 = math.tanh %261 : vector<2x128xf32>
    %268 = vector.extract_strided_slice %266 {offsets = [0, 0], sizes = [2, 32], strides = [1, 1]} : vector<2x128xf32> to vector<2x32xf32>
    %269 = vector.extract_strided_slice %266 {offsets = [0, 32], sizes = [2, 32], strides = [1, 1]} : vector<2x128xf32> to vector<2x32xf32>
    %270 = vector.extract_strided_slice %267 {offsets = [0, 64], sizes = [2, 32], strides = [1, 1]} : vector<2x128xf32> to vector<2x32xf32>
    %271 = vector.extract_strided_slice %266 {offsets = [0, 96], sizes = [2, 32], strides = [1, 1]} : vector<2x128xf32> to vector<2x32xf32>
    %272 = arith.mulf %269, %224 : vector<2x32xf32>
    %273 = arith.mulf %268, %270 : vector<2x32xf32>
    %274 = arith.addf %272, %273 : vector<2x32xf32>
    %275 = math.tanh %274 : vector<2x32xf32>
    %276 = arith.mulf %271, %275 : vector<2x32xf32>
    %277 = arith.truncf %276 : vector<2x32xf32> to vector<2x32xbf16>
    %cst_78 = arith.constant dense<0.000000e+00> : vector<2x128xf32>
    %278 = tpu.matmul %277, %12, %cst_78 {dimension_numbers = #tpu.dot_dimension_numbers<[1], [0], [0], [1], [0, 0, 1, 1], [], []>} : vector<2x32xbf16>, vector<32x128xbf16>, vector<2x128xf32> -> vector<2x128xf32>
    %279 = vector.broadcast %13 : vector<1x128xf32> to vector<2x128xf32>
    %280 = arith.addf %278, %279 : vector<2x128xf32>
    %c4 = arith.constant 4 : index
    %c0_79 = arith.constant 0 : index
    %c0_80 = arith.constant 0 : index
    %281 = vector.load %arg9[%c4, %c0_79, %c0_80] : memref<8x2x128xf32, #tpu.memory_space<vmem>>, vector<1x2x128xf32>
    %282 = vector.shape_cast %281 : vector<1x2x128xf32> to vector<2x128xf32>
    %283 = vector.shape_cast %280 : vector<2x128xf32> to vector<1x2x128xf32>
    tpu.vector_store %arg9[%c4, %c0_79, %c0_80], %283 {strides = array<i32>} : memref<8x2x128xf32, #tpu.memory_space<vmem>>, vector<1x2x128xf32>,
    %284 = vector.extract_strided_slice %25 {offsets = [10, 0], sizes = [2, 128], strides = [1, 1]} : vector<16x128xf32> to vector<2x128xf32>
    %285 = arith.truncf %254 : vector<2x32xf32> to vector<2x32xbf16>
    %cst_81 = arith.constant dense<0.000000e+00> : vector<2x128xf32>
    %286 = tpu.matmul %285, %5, %cst_81 {dimension_numbers = #tpu.dot_dimension_numbers<[1], [0], [0], [1], [0, 0, 1, 1], [], []>} : vector<2x32xbf16>, vector<32x128xbf16>, vector<2x128xf32> -> vector<2x128xf32>
    %287 = arith.addf %284, %286 : vector<2x128xf32>
    %288 = vector.broadcast %9 : vector<1x128xf32> to vector<2x128xf32>
    %289 = arith.addf %287, %288 : vector<2x128xf32>
    %290 = arith.negf %289 : vector<2x128xf32>
    %291 = math.exp %290 : vector<2x128xf32>
    %cst_82 = arith.constant 1.000000e+00 : f32
    %292 = vector.broadcast %cst_82 : f32 to vector<2x128xf32>
    %293 = arith.addf %292, %291 : vector<2x128xf32>
    %294 = arith.divf %292, %293 : vector<2x128xf32>
    %295 = math.tanh %289 : vector<2x128xf32>
    %296 = vector.extract_strided_slice %294 {offsets = [0, 0], sizes = [2, 32], strides = [1, 1]} : vector<2x128xf32> to vector<2x32xf32>
    %297 = vector.extract_strided_slice %294 {offsets = [0, 32], sizes = [2, 32], strides = [1, 1]} : vector<2x128xf32> to vector<2x32xf32>
    %298 = vector.extract_strided_slice %295 {offsets = [0, 64], sizes = [2, 32], strides = [1, 1]} : vector<2x128xf32> to vector<2x32xf32>
    %299 = vector.extract_strided_slice %294 {offsets = [0, 96], sizes = [2, 32], strides = [1, 1]} : vector<2x128xf32> to vector<2x32xf32>
    %300 = arith.mulf %297, %252 : vector<2x32xf32>
    %301 = arith.mulf %296, %298 : vector<2x32xf32>
    %302 = arith.addf %300, %301 : vector<2x32xf32>
    %303 = math.tanh %302 : vector<2x32xf32>
    %304 = arith.mulf %299, %303 : vector<2x32xf32>
    %305 = arith.truncf %304 : vector<2x32xf32> to vector<2x32xbf16>
    %cst_83 = arith.constant dense<0.000000e+00> : vector<2x128xf32>
    %306 = tpu.matmul %305, %3, %cst_83 {dimension_numbers = #tpu.dot_dimension_numbers<[1], [0], [0], [1], [0, 0, 1, 1], [], []>} : vector<2x32xbf16>, vector<32x128xbf16>, vector<2x128xf32> -> vector<2x128xf32>
    %307 = arith.truncf %276 : vector<2x32xf32> to vector<2x32xbf16>
    %cst_84 = arith.constant dense<0.000000e+00> : vector<2x128xf32>
    %308 = tpu.matmul %307, %7, %cst_84 {dimension_numbers = #tpu.dot_dimension_numbers<[1], [0], [0], [1], [0, 0, 1, 1], [], []>} : vector<2x32xbf16>, vector<32x128xbf16>, vector<2x128xf32> -> vector<2x128xf32>
    %309 = arith.addf %306, %308 : vector<2x128xf32>
    %310 = vector.broadcast %11 : vector<1x128xf32> to vector<2x128xf32>
    %311 = arith.addf %309, %310 : vector<2x128xf32>
    %312 = arith.negf %311 : vector<2x128xf32>
    %313 = math.exp %312 : vector<2x128xf32>
    %cst_85 = arith.constant 1.000000e+00 : f32
    %314 = vector.broadcast %cst_85 : f32 to vector<2x128xf32>
    %315 = arith.addf %314, %313 : vector<2x128xf32>
    %316 = arith.divf %314, %315 : vector<2x128xf32>
    %317 = math.tanh %311 : vector<2x128xf32>
    %318 = vector.extract_strided_slice %316 {offsets = [0, 0], sizes = [2, 32], strides = [1, 1]} : vector<2x128xf32> to vector<2x32xf32>
    %319 = vector.extract_strided_slice %316 {offsets = [0, 32], sizes = [2, 32], strides = [1, 1]} : vector<2x128xf32> to vector<2x32xf32>
    %320 = vector.extract_strided_slice %317 {offsets = [0, 64], sizes = [2, 32], strides = [1, 1]} : vector<2x128xf32> to vector<2x32xf32>
    %321 = vector.extract_strided_slice %316 {offsets = [0, 96], sizes = [2, 32], strides = [1, 1]} : vector<2x128xf32> to vector<2x32xf32>
    %322 = arith.mulf %319, %274 : vector<2x32xf32>
    %323 = arith.mulf %318, %320 : vector<2x32xf32>
    %324 = arith.addf %322, %323 : vector<2x32xf32>
    %325 = math.tanh %324 : vector<2x32xf32>
    %326 = arith.mulf %321, %325 : vector<2x32xf32>
    %327 = arith.truncf %326 : vector<2x32xf32> to vector<2x32xbf16>
    %cst_86 = arith.constant dense<0.000000e+00> : vector<2x128xf32>
    %328 = tpu.matmul %327, %12, %cst_86 {dimension_numbers = #tpu.dot_dimension_numbers<[1], [0], [0], [1], [0, 0, 1, 1], [], []>} : vector<2x32xbf16>, vector<32x128xbf16>, vector<2x128xf32> -> vector<2x128xf32>
    %329 = vector.broadcast %13 : vector<1x128xf32> to vector<2x128xf32>
    %330 = arith.addf %328, %329 : vector<2x128xf32>
    %c5 = arith.constant 5 : index
    %c0_87 = arith.constant 0 : index
    %c0_88 = arith.constant 0 : index
    %331 = vector.load %arg9[%c5, %c0_87, %c0_88] : memref<8x2x128xf32, #tpu.memory_space<vmem>>, vector<1x2x128xf32>
    %332 = vector.shape_cast %331 : vector<1x2x128xf32> to vector<2x128xf32>
    %333 = vector.shape_cast %330 : vector<2x128xf32> to vector<1x2x128xf32>
    tpu.vector_store %arg9[%c5, %c0_87, %c0_88], %333 {strides = array<i32>} : memref<8x2x128xf32, #tpu.memory_space<vmem>>, vector<1x2x128xf32>,
    %334 = vector.extract_strided_slice %25 {offsets = [12, 0], sizes = [2, 128], strides = [1, 1]} : vector<16x128xf32> to vector<2x128xf32>
    %335 = arith.truncf %304 : vector<2x32xf32> to vector<2x32xbf16>
    %cst_89 = arith.constant dense<0.000000e+00> : vector<2x128xf32>
    %336 = tpu.matmul %335, %5, %cst_89 {dimension_numbers = #tpu.dot_dimension_numbers<[1], [0], [0], [1], [0, 0, 1, 1], [], []>} : vector<2x32xbf16>, vector<32x128xbf16>, vector<2x128xf32> -> vector<2x128xf32>
    %337 = arith.addf %334, %336 : vector<2x128xf32>
    %338 = vector.broadcast %9 : vector<1x128xf32> to vector<2x128xf32>
    %339 = arith.addf %337, %338 : vector<2x128xf32>
    %340 = arith.negf %339 : vector<2x128xf32>
    %341 = math.exp %340 : vector<2x128xf32>
    %cst_90 = arith.constant 1.000000e+00 : f32
    %342 = vector.broadcast %cst_90 : f32 to vector<2x128xf32>
    %343 = arith.addf %342, %341 : vector<2x128xf32>
    %344 = arith.divf %342, %343 : vector<2x128xf32>
    %345 = math.tanh %339 : vector<2x128xf32>
    %346 = vector.extract_strided_slice %344 {offsets = [0, 0], sizes = [2, 32], strides = [1, 1]} : vector<2x128xf32> to vector<2x32xf32>
    %347 = vector.extract_strided_slice %344 {offsets = [0, 32], sizes = [2, 32], strides = [1, 1]} : vector<2x128xf32> to vector<2x32xf32>
    %348 = vector.extract_strided_slice %345 {offsets = [0, 64], sizes = [2, 32], strides = [1, 1]} : vector<2x128xf32> to vector<2x32xf32>
    %349 = vector.extract_strided_slice %344 {offsets = [0, 96], sizes = [2, 32], strides = [1, 1]} : vector<2x128xf32> to vector<2x32xf32>
    %350 = arith.mulf %347, %302 : vector<2x32xf32>
    %351 = arith.mulf %346, %348 : vector<2x32xf32>
    %352 = arith.addf %350, %351 : vector<2x32xf32>
    %353 = math.tanh %352 : vector<2x32xf32>
    %354 = arith.mulf %349, %353 : vector<2x32xf32>
    %355 = arith.truncf %354 : vector<2x32xf32> to vector<2x32xbf16>
    %cst_91 = arith.constant dense<0.000000e+00> : vector<2x128xf32>
    %356 = tpu.matmul %355, %3, %cst_91 {dimension_numbers = #tpu.dot_dimension_numbers<[1], [0], [0], [1], [0, 0, 1, 1], [], []>} : vector<2x32xbf16>, vector<32x128xbf16>, vector<2x128xf32> -> vector<2x128xf32>
    %357 = arith.truncf %326 : vector<2x32xf32> to vector<2x32xbf16>
    %cst_92 = arith.constant dense<0.000000e+00> : vector<2x128xf32>
    %358 = tpu.matmul %357, %7, %cst_92 {dimension_numbers = #tpu.dot_dimension_numbers<[1], [0], [0], [1], [0, 0, 1, 1], [], []>} : vector<2x32xbf16>, vector<32x128xbf16>, vector<2x128xf32> -> vector<2x128xf32>
    %359 = arith.addf %356, %358 : vector<2x128xf32>
    %360 = vector.broadcast %11 : vector<1x128xf32> to vector<2x128xf32>
    %361 = arith.addf %359, %360 : vector<2x128xf32>
    %362 = arith.negf %361 : vector<2x128xf32>
    %363 = math.exp %362 : vector<2x128xf32>
    %cst_93 = arith.constant 1.000000e+00 : f32
    %364 = vector.broadcast %cst_93 : f32 to vector<2x128xf32>
    %365 = arith.addf %364, %363 : vector<2x128xf32>
    %366 = arith.divf %364, %365 : vector<2x128xf32>
    %367 = math.tanh %361 : vector<2x128xf32>
    %368 = vector.extract_strided_slice %366 {offsets = [0, 0], sizes = [2, 32], strides = [1, 1]} : vector<2x128xf32> to vector<2x32xf32>
    %369 = vector.extract_strided_slice %366 {offsets = [0, 32], sizes = [2, 32], strides = [1, 1]} : vector<2x128xf32> to vector<2x32xf32>
    %370 = vector.extract_strided_slice %367 {offsets = [0, 64], sizes = [2, 32], strides = [1, 1]} : vector<2x128xf32> to vector<2x32xf32>
    %371 = vector.extract_strided_slice %366 {offsets = [0, 96], sizes = [2, 32], strides = [1, 1]} : vector<2x128xf32> to vector<2x32xf32>
    %372 = arith.mulf %369, %324 : vector<2x32xf32>
    %373 = arith.mulf %368, %370 : vector<2x32xf32>
    %374 = arith.addf %372, %373 : vector<2x32xf32>
    %375 = math.tanh %374 : vector<2x32xf32>
    %376 = arith.mulf %371, %375 : vector<2x32xf32>
    %377 = arith.truncf %376 : vector<2x32xf32> to vector<2x32xbf16>
    %cst_94 = arith.constant dense<0.000000e+00> : vector<2x128xf32>
    %378 = tpu.matmul %377, %12, %cst_94 {dimension_numbers = #tpu.dot_dimension_numbers<[1], [0], [0], [1], [0, 0, 1, 1], [], []>} : vector<2x32xbf16>, vector<32x128xbf16>, vector<2x128xf32> -> vector<2x128xf32>
    %379 = vector.broadcast %13 : vector<1x128xf32> to vector<2x128xf32>
    %380 = arith.addf %378, %379 : vector<2x128xf32>
    %c6 = arith.constant 6 : index
    %c0_95 = arith.constant 0 : index
    %c0_96 = arith.constant 0 : index
    %381 = vector.load %arg9[%c6, %c0_95, %c0_96] : memref<8x2x128xf32, #tpu.memory_space<vmem>>, vector<1x2x128xf32>
    %382 = vector.shape_cast %381 : vector<1x2x128xf32> to vector<2x128xf32>
    %383 = vector.shape_cast %380 : vector<2x128xf32> to vector<1x2x128xf32>
    tpu.vector_store %arg9[%c6, %c0_95, %c0_96], %383 {strides = array<i32>} : memref<8x2x128xf32, #tpu.memory_space<vmem>>, vector<1x2x128xf32>,
    %384 = vector.extract_strided_slice %25 {offsets = [14, 0], sizes = [2, 128], strides = [1, 1]} : vector<16x128xf32> to vector<2x128xf32>
    %385 = arith.truncf %354 : vector<2x32xf32> to vector<2x32xbf16>
    %cst_97 = arith.constant dense<0.000000e+00> : vector<2x128xf32>
    %386 = tpu.matmul %385, %5, %cst_97 {dimension_numbers = #tpu.dot_dimension_numbers<[1], [0], [0], [1], [0, 0, 1, 1], [], []>} : vector<2x32xbf16>, vector<32x128xbf16>, vector<2x128xf32> -> vector<2x128xf32>
    %387 = arith.addf %384, %386 : vector<2x128xf32>
    %388 = vector.broadcast %9 : vector<1x128xf32> to vector<2x128xf32>
    %389 = arith.addf %387, %388 : vector<2x128xf32>
    %390 = arith.negf %389 : vector<2x128xf32>
    %391 = math.exp %390 : vector<2x128xf32>
    %cst_98 = arith.constant 1.000000e+00 : f32
    %392 = vector.broadcast %cst_98 : f32 to vector<2x128xf32>
    %393 = arith.addf %392, %391 : vector<2x128xf32>
    %394 = arith.divf %392, %393 : vector<2x128xf32>
    %395 = math.tanh %389 : vector<2x128xf32>
    %396 = vector.extract_strided_slice %394 {offsets = [0, 0], sizes = [2, 32], strides = [1, 1]} : vector<2x128xf32> to vector<2x32xf32>
    %397 = vector.extract_strided_slice %394 {offsets = [0, 32], sizes = [2, 32], strides = [1, 1]} : vector<2x128xf32> to vector<2x32xf32>
    %398 = vector.extract_strided_slice %395 {offsets = [0, 64], sizes = [2, 32], strides = [1, 1]} : vector<2x128xf32> to vector<2x32xf32>
    %399 = vector.extract_strided_slice %394 {offsets = [0, 96], sizes = [2, 32], strides = [1, 1]} : vector<2x128xf32> to vector<2x32xf32>
    %400 = arith.mulf %397, %352 : vector<2x32xf32>
    %401 = arith.mulf %396, %398 : vector<2x32xf32>
    %402 = arith.addf %400, %401 : vector<2x32xf32>
    %403 = math.tanh %402 : vector<2x32xf32>
    %404 = arith.mulf %399, %403 : vector<2x32xf32>
    %405 = arith.truncf %404 : vector<2x32xf32> to vector<2x32xbf16>
    %cst_99 = arith.constant dense<0.000000e+00> : vector<2x128xf32>
    %406 = tpu.matmul %405, %3, %cst_99 {dimension_numbers = #tpu.dot_dimension_numbers<[1], [0], [0], [1], [0, 0, 1, 1], [], []>} : vector<2x32xbf16>, vector<32x128xbf16>, vector<2x128xf32> -> vector<2x128xf32>
    %407 = arith.truncf %376 : vector<2x32xf32> to vector<2x32xbf16>
    %cst_100 = arith.constant dense<0.000000e+00> : vector<2x128xf32>
    %408 = tpu.matmul %407, %7, %cst_100 {dimension_numbers = #tpu.dot_dimension_numbers<[1], [0], [0], [1], [0, 0, 1, 1], [], []>} : vector<2x32xbf16>, vector<32x128xbf16>, vector<2x128xf32> -> vector<2x128xf32>
    %409 = arith.addf %406, %408 : vector<2x128xf32>
    %410 = vector.broadcast %11 : vector<1x128xf32> to vector<2x128xf32>
    %411 = arith.addf %409, %410 : vector<2x128xf32>
    %412 = arith.negf %411 : vector<2x128xf32>
    %413 = math.exp %412 : vector<2x128xf32>
    %cst_101 = arith.constant 1.000000e+00 : f32
    %414 = vector.broadcast %cst_101 : f32 to vector<2x128xf32>
    %415 = arith.addf %414, %413 : vector<2x128xf32>
    %416 = arith.divf %414, %415 : vector<2x128xf32>
    %417 = math.tanh %411 : vector<2x128xf32>
    %418 = vector.extract_strided_slice %416 {offsets = [0, 0], sizes = [2, 32], strides = [1, 1]} : vector<2x128xf32> to vector<2x32xf32>
    %419 = vector.extract_strided_slice %416 {offsets = [0, 32], sizes = [2, 32], strides = [1, 1]} : vector<2x128xf32> to vector<2x32xf32>
    %420 = vector.extract_strided_slice %417 {offsets = [0, 64], sizes = [2, 32], strides = [1, 1]} : vector<2x128xf32> to vector<2x32xf32>
    %421 = vector.extract_strided_slice %416 {offsets = [0, 96], sizes = [2, 32], strides = [1, 1]} : vector<2x128xf32> to vector<2x32xf32>
    %422 = arith.mulf %419, %374 : vector<2x32xf32>
    %423 = arith.mulf %418, %420 : vector<2x32xf32>
    %424 = arith.addf %422, %423 : vector<2x32xf32>
    %425 = math.tanh %424 : vector<2x32xf32>
    %426 = arith.mulf %421, %425 : vector<2x32xf32>
    %427 = arith.truncf %426 : vector<2x32xf32> to vector<2x32xbf16>
    %cst_102 = arith.constant dense<0.000000e+00> : vector<2x128xf32>
    %428 = tpu.matmul %427, %12, %cst_102 {dimension_numbers = #tpu.dot_dimension_numbers<[1], [0], [0], [1], [0, 0, 1, 1], [], []>} : vector<2x32xbf16>, vector<32x128xbf16>, vector<2x128xf32> -> vector<2x128xf32>
    %429 = vector.broadcast %13 : vector<1x128xf32> to vector<2x128xf32>
    %430 = arith.addf %428, %429 : vector<2x128xf32>
    %c7 = arith.constant 7 : index
    %c0_103 = arith.constant 0 : index
    %c0_104 = arith.constant 0 : index
    %431 = vector.load %arg9[%c7, %c0_103, %c0_104] : memref<8x2x128xf32, #tpu.memory_space<vmem>>, vector<1x2x128xf32>
    %432 = vector.shape_cast %431 : vector<1x2x128xf32> to vector<2x128xf32>
    %433 = vector.shape_cast %430 : vector<2x128xf32> to vector<1x2x128xf32>
    tpu.vector_store %arg9[%c7, %c0_103, %c0_104], %433 {strides = array<i32>} : memref<8x2x128xf32, #tpu.memory_space<vmem>>, vector<1x2x128xf32>,
    %c0_105 = arith.constant 0 : index
    %c0_106 = arith.constant 0 : index
    %c0_107 = arith.constant 0 : index
    %434 = vector.load %arg10[%c0_105, %c0_106, %c0_107] : memref<2x2x32xf32, #tpu.memory_space<vmem>>, vector<1x2x32xf32>
    %435 = vector.shape_cast %434 : vector<1x2x32xf32> to vector<2x32xf32>
    %436 = vector.shape_cast %404 : vector<2x32xf32> to vector<1x2x32xf32>
    tpu.vector_store %arg10[%c0_105, %c0_106, %c0_107], %436 {strides = array<i32>} : memref<2x2x32xf32, #tpu.memory_space<vmem>>, vector<1x2x32xf32>,
    %c0_108 = arith.constant 0 : index
    %c0_109 = arith.constant 0 : index
    %c0_110 = arith.constant 0 : index
    %437 = vector.load %arg11[%c0_108, %c0_109, %c0_110] : memref<2x2x32xf32, #tpu.memory_space<vmem>>, vector<1x2x32xf32>
    %438 = vector.shape_cast %437 : vector<1x2x32xf32> to vector<2x32xf32>
    %439 = vector.shape_cast %402 : vector<2x32xf32> to vector<1x2x32xf32>
    tpu.vector_store %arg11[%c0_108, %c0_109, %c0_110], %439 {strides = array<i32>} : memref<2x2x32xf32, #tpu.memory_space<vmem>>, vector<1x2x32xf32>,
    %c1_111 = arith.constant 1 : index
    %c0_112 = arith.constant 0 : index
    %c0_113 = arith.constant 0 : index
    %440 = vector.load %arg10[%c1_111, %c0_112, %c0_113] : memref<2x2x32xf32, #tpu.memory_space<vmem>>, vector<1x2x32xf32>
    %441 = vector.shape_cast %440 : vector<1x2x32xf32> to vector<2x32xf32>
    %442 = vector.shape_cast %426 : vector<2x32xf32> to vector<1x2x32xf32>
    tpu.vector_store %arg10[%c1_111, %c0_112, %c0_113], %442 {strides = array<i32>} : memref<2x2x32xf32, #tpu.memory_space<vmem>>, vector<1x2x32xf32>,
    %c1_114 = arith.constant 1 : index
    %c0_115 = arith.constant 0 : index
    %c0_116 = arith.constant 0 : index
    %443 = vector.load %arg11[%c1_114, %c0_115, %c0_116] : memref<2x2x32xf32, #tpu.memory_space<vmem>>, vector<1x2x32xf32>
    %444 = vector.shape_cast %443 : vector<1x2x32xf32> to vector<2x32xf32>
    %445 = vector.shape_cast %424 : vector<2x32xf32> to vector<1x2x32xf32>
    tpu.vector_store %arg11[%c1_114, %c0_115, %c0_116], %445 {strides = array<i32>} : memref<2x2x32xf32, #tpu.memory_space<vmem>>, vector<1x2x32xf32>,
    return
  }
}

</mosaic_0001>

<bundles_post_ra>
// kernel: rnn_model_forward.1
= control target key start
LH: loop header
LB: loop body
LE: loop exit
PB: predicated region body
PF: predicated region fallthrough
CT: control target
= control target key end

     0   :  { %17 = vsyncpa [#allocation3], 0  ;;  %v2975_v1 = vmov 0   ;;  %v2976_v2 = vmov 0.0   ;;  %vm2977_vm0 = vmmov 0   ;;  %s3640_s0 = inlined_call_operand.vmem [shape: s32[16,1], index: 0, kind: input, shape index: {}]   ;;  %s3641_s1 = inlined_call_operand.vmem [shape: bf16[128,32], index: 1, kind: input, shape index: {}]   ;;  %s3642_s2 = inlined_call_operand.vmem [shape: bf16[2,32,128], index: 2, kind: input, shape index: {}]   ;;  %s3643_s3 = inlined_call_operand.vmem [shape: bf16[2,32,128], index: 3, kind: input, shape index: {}]   ;;  %s3644_s4 = inlined_call_operand.vmem [shape: f32[2,1,128], index: 4, kind: input, shape index: {}]   ;;  %s3645_s5 = inlined_call_operand.vmem [shape: f32[2,2,32], index: 5, kind: input, shape index: {}]   ;;  %s3646_s6 = inlined_call_operand.vmem [shape: f32[2,2,32], index: 6, kind: input, shape index: {}]   ;;  %s3647_s7 = inlined_call_operand.vmem [shape: bf16[32,128], index: 7, kind: input, shape index: {}]   ;;  %s3648_s8 = inlined_call_operand.vmem [shape: f32[1,128], index: 8, kind: input, shape index: {}]   ;;  %s3649_s9 = inlined_call_operand.hbm [shape: f32[8,2,128], index: 9, kind: output, shape index: {0}]   ;;  %s3650_s10 = inlined_call_operand.hbm [shape: f32[2,2,32], index: 10, kind: output, shape index: {1}]   ;;  %s3651_s11 = inlined_call_operand.hbm [shape: f32[2,2,32], index: 11, kind: output, shape index: {2}]  }
   0x1   :  { %v64_v0 = vld [vmem:[%s3640_s0] sm:$0xff]  ;;  %2747 = vset.pattern.permute.xlu0 %v2975_v1  ;;  %2452 = vmatprep.subr.bf16.mxu0 %v2976_v2  ;;  %v65_v4 = vld [vmem:[%s3640_s0 + $0x8] sm:$0xff]  ;;  %v2750_v6 = vld [vmem:[%s3641_s1 + $0x10] sm:$0xff]  }
   0x2   :  { %v2748_v3 = vld [vmem:[%s3641_s1] sm:$0xff]   ;;  %69 = vperm.xlu0 %2747, %v64_v0   ;;  %2472 = vmatprep.subr.bf16.mxu1 %v2976_v2  ;;  %v2749_v5 = vld [vmem:[%s3641_s1 + $0x8] sm:$0xff]   ;;  %v2751_v8 = vld [vmem:[%s3641_s1 + $0x18] sm:$0xff]  }
   0x3   :  { %2453 = vmatpush3.bf16.msra.mxu0 %v2748_v3  ;;  %2468 = vmatprep.mubr.msk.bf16.mxu0 %vm2977_vm0, %v2976_v2  ;;  %v2756_v7 = vld [vmem:[%s3642_s2] sm:$0xff]  }
   0x4   :  { %2454 = vmatprep.subr.bf16.mxu0 %v2976_v2  ;;  %2476 = vmatprep.mubr.msk.bf16.mxu1 %vm2977_vm0, %v2976_v2  ;;  %v2752_v9 = vld [vmem:[%s3641_s1 + $0x20] sm:$0xff]  }
   0x5   :  { %2473 = vmatpush3.bf16.msra.mxu1 %v2756_v7 }
   0x6   :  { %72 = vperm.xlu0 %2747, %v65_v4   ;;  %2474 = vmatprep.subr.bf16.mxu1 %v2976_v2 }
   0x7   :  { %2455 = vmatpush3.bf16.msra.mxu0 %v2749_v5 }
   0x8   :  { %2456 = vmatprep.subr.bf16.mxu0 %v2976_v2 }
   0xb   :  { %2457 = vmatpush3.bf16.msra.mxu0 %v2750_v6 }
   0xc   :  { %2458 = vmatprep.subr.bf16.mxu0 %v2976_v2 }
   0xf   :  { %2459 = vmatpush3.bf16.msra.mxu0 %v2751_v8 }
  0x10   :  { %18 = vsyncpa [#allocation5], 0  ;;  %2460 = vmatprep.subr.bf16.mxu0 %v2976_v2  ;;  %v2753_v10 = vld [vmem:[%s3641_s1 + $0x28] sm:$0xff]   ;;  %v2754_v11 = vld [vmem:[%s3641_s1 + $0x30] sm:$0xff]   ;;  %v66_v13 = vlaneseq  ;;  %v2978_v17 = vmov 1.0|1.0  }
  0x11   :  { %v2755_v12 = vld [vmem:[%s3641_s1 + $0x38] sm:$0xff]   ;;  %v2757_v18 = vld [vmem:[%s3642_s2 + $0x8] sm:$0xff]   ;;  %vm197_vm4 = vcmask 261120   ;;  %v3103_v22 = vld [vmem:[%s3643_s3] sm:$0xff]   ;;  %s2979_s27 = smov 64   ;;  %s2980_s30 = smov 32  }
  0x12   :  { %v67_v15 = vand.u32 127, %v66_v13  ;;  %2475 = vmatpush3.bf16.msra.mxu1 %v2757_v18  ;;  %v3110_v25 = vld [vmem:[%s3643_s3 + $0x8] sm:$0xff]   ;;  %v242_v26 = vld [vmem:[%s3645_s5] sm:$0x3]  ;;  %v3146_v51 = vld [vmem:[%s3643_s3 + $0x10] sm:$0xff]   ;;  %vm2194_vm5 = vcmask 261126  }
  0x13   :  { %2461 = vmatpush3.bf16.msra.mxu0 %v2752_v9  ;;  %2480 = vmatprep.subr.bf16.mxu1 %v2976_v2  ;;  %v248_v27 = vpack.c.bf16 %v242_v26, %v242_v26  ;;  %v3130_v32 = vld [vmem:[%s3644_s4] ss:$0 sm:$0xff]  ;;  %v3152_v52 = vld [vmem:[%s3643_s3 + $0x18] sm:$0xff]   ;;  %v2283_v53 = vld [vmem:[%s3645_s5 + $0x2] sm:$0x3]  ;;  %vm2206_vm6 = vcmask 254976  }
  0x14   :  { %2462 = vmatprep.subr.bf16.mxu0 %v2976_v2  ;;  %v245_v40 = vld [vmem:[%s3646_s6] sm:$0x3]  ;;  %v341_v54 = vpack.c.bf16 %v2283_v53, %v2283_v53  ;;  %v3162_v55 = vld [vmem:[%s3642_s2 + $0x10] sm:$0xff]   ;;  %v3171_v57 = vld [vmem:[%s3642_s2 + $0x18] sm:$0xff]  }
  0x15   :  { %v3196_v3 = vld [vmem:[%s3644_s4 + $0x1] ss:$0 sm:$0xff]  ;;  %v2284_v18 = vld [vmem:[%s3646_s6 + $0x2] sm:$0x3] }
  0x17   :  { %2463 = vmatpush3.bf16.msra.mxu0 %v2753_v10 }
  0x18   :  { %2464 = vmatprep.subr.bf16.mxu0 %v2976_v2 }
  0x1b   :  { %2465 = vmatpush3.bf16.msra.mxu0 %v2754_v11 }
  0x1c   :  { %2466 = vmatprep.subr.bf16.mxu0 %v2976_v2 }
  0x1f   :  { %2467 = vmatpush3.bf16.msra.mxu0 %v2755_v12 }
  0x20   :  { %2504 = vmatprep.subr.bf16.mxu0 %v2976_v2 }
  0x81   :  { %v70_v14 = vpop.permute.xlu0 %69 }
  0x82   :  { %vm74_vm1 = vcmp.eq.s32.totalorder %v67_v15, %v70_v14 }
  0x85   :  { %v73_v16 = vpop.permute.xlu0 %72 }
  0x86   :  { %vm75_vm2 = vcmp.eq.s32.totalorder %v67_v15, %v73_v16 }
  0x87   :  { %vm2278_vm3 = vmpackc.low %vm75_vm2, %vm74_vm1 }
  0x88   :  { %2469 = vmatmul.mubr.msk.bf16.vlgmr.msra.gmra.mrb[0].mxu0 %vm2278_vm3, %v2978_v17 }
  0x89   :  { %2508 = vmatprep.mubr.msk.bf16.mxu0 %vm2977_vm0, %v2976_v2 }
 0x15b   :  { %v177_v19 = vpop.f32.mrb[0].mxu0 }
 0x15c   :  { %v2470_v20 = vpop.f32.mrb[1].mxu0 }
 0x15d   :  { %v180_v21 = vpop.f32.mrb[2].mxu0 }
 0x15e   :  { %v184_v23 = vpack.c.bf16 %v180_v21, %v177_v19  ;;  %v2471_v24 = vpop.f32.mrb[3].mxu0 }
 0x160   :  { %2477 = vmatmul.mubr.msk.bf16.vlgmr.msra.gmra.mrb[0].mxu1 %vm197_vm4, %v184_v23 }
 0x161   :  { %2481 = vmatpush3.bf16.msra.mxu1 %v3103_v22  ;;  %2484 = vmatprep.mubr.msk.bf16.mxu1 %vm2977_vm0, %v2976_v2 }
 0x162   :  { %2482 = vmatprep.subr.bf16.mxu1 %v2976_v2 }
 0x165   :  { %2483 = vmatpush3.bf16.msra.mxu1 %v3110_v25 }
 0x166   :  { %2488 = vmatprep.subr.bf16.mxu1 %v2976_v2 }
 0x168   :  { %2485 = vmatmul.mubr.msk.bf16.vlgmr.msra.gmra.mrb[4].mxu1 %vm197_vm4, %v248_v27 }
 0x169   :  { %2492 = vmatprep.mubr.msk.bf16.mxu1 %vm2977_vm0, %v2976_v2  ;;  %2489 = vmatpush3.bf16.msra.mxu1 %v3146_v51 }
 0x16a   :  { %2490 = vmatprep.subr.bf16.mxu1 %v2976_v2 }
 0x16d   :  { %2491 = vmatpush3.bf16.msra.mxu1 %v3152_v52 }
 0x16e   :  { %2496 = vmatprep.subr.bf16.mxu1 %v2976_v2 }
 0x170   :  { %2493 = vmatmul.mubr.msk.bf16.vlgmr.msra.gmra.mrb[8].mxu1 %vm197_vm4, %v341_v54 }
 0x171   :  { %2497 = vmatpush3.bf16.msra.mxu1 %v3162_v55  ;;  %2500 = vmatprep.mubr.msk.bf16.mxu1 %vm2977_vm0, %v2976_v2 }
 0x172   :  { %2498 = vmatprep.subr.bf16.mxu1 %v2976_v2 }
 0x175   :  { %2499 = vmatpush3.bf16.msra.mxu1 %v3171_v57 }
 0x176   :  { %2512 = vmatprep.subr.bf16.mxu1 %v2976_v2 }
 0x233   :  { %v3123_v28 = vpop.f32.mrb[0].mxu1 }
 0x234   :  { %v2478_v29 = vpop.f32.mrb[1].mxu1 }
 0x235   :  { %v3125_v30 = vpop.f32.mrb[2].mxu1 }
 0x236   :  { %v2479_v31 = vpop.f32.mrb[3].mxu1 }
 0x23b   :  { %v298_v33 = vpop.f32.mrb[4].mxu1 }
 0x23c   :  { %v304_v34 = vadd.f32 %v298_v33, %v3123_v28  ;;  %v2486_v35 = vpop.f32.mrb[5].mxu1 }
 0x23d   :  { %v301_v36 = vpop.f32.mrb[6].mxu1 }
 0x23e   :  { %v311_v37 = vadd.f32 %v3130_v32, %v304_v34  ;;  %v2487_v38 = vpop.f32.mrb[7].mxu1 }
 0x240   :  { %2766 = vtanh.f32 %v311_v37  ;;  %v2289_v41 = vmul.f32 -1.442695, %v311_v37 }
 0x242   :  { %2768 = vpow2.f32 %v2289_v41 }
 0x243   :  { %v391_v61 = vpop.f32.mrb[8].mxu1 }
 0x244   :  { %v2494_v62 = vpop.f32.mrb[9].mxu1 }
 0x245   :  { %v394_v63 = vpop.f32.mrb[10].mxu1 }
 0x246   :  { %v2495_v0 = vpop.f32.mrb[11].mxu1  ;;  %v3265_v63 = vld [vmem:[%s3648_s8] ss:$0 sm:$0xff] }
 0x24a   :  { %v2767_v39 = vpop.eup %2766 }
 0x24b   :  { %325 = vrot.lane.b32.xlu1 %v2767_v39, %s2979_s27 }
 0x24c   :  { %v2769_v42 = vpop.eup %2768 }
 0x24d   :  { %v315_v43 = vadd.f32 1.0, %v2769_v42 }
 0x24f   :  { %320 = vrot.lane.b32.xlu1 %v245_v40, %s2980_s30  ;;  %2770 = vrcp.f32 %v315_v43 }
 0x259   :  { %v2771_v44 = vpop.eup %2770 }
 0x2bd   :  { %v326_v45 = vpop.permute.xlu1 %325 }
 0x2be   :  { %v328_v46 = vmul.f32 %v2771_v44, %v326_v45  ;;  %v3219_v45 = vld [vmem:[%s3647_s7] sm:$0xff]  }
 0x2bf   :  { %2505 = vmatpush3.bf16.msra.mxu0 %v3219_v45 }
 0x2c0   :  { %330 = vrot.lane.b32.xlu0 %v328_v46, %s2980_s30  ;;  %v3225_v46 = vld [vmem:[%s3647_s7 + $0x8] sm:$0xff]   ;;  %2506 = vmatprep.subr.bf16.mxu0 %v2976_v2 }
 0x2c1   :  { %v321_v47 = vpop.permute.xlu1 %320 }
 0x2c2   :  { %v323_v48 = vmul.f32 %v2771_v44, %v321_v47 }
 0x2c3   :  { %2507 = vmatpush3.bf16.msra.mxu0 %v3225_v46 }
 0x2c4   :  { %2520 = vmatprep.subr.bf16.mxu0 %v2976_v2 }
 0x332   :  { %v331_v49 = vpop.permute.xlu0 %330 }
 0x333   :  { %v3140_v50 = vadd.f32 %v331_v49, %v323_v48 }
 0x335   :  { %2772 = vtanh.f32 %v3140_v50  ;;  %v609_v37 = vrot.slane %v3140_v50, 6 }
 0x33f   :  { %v2773_v56 = vpop.eup %2772 }
 0x340   :  { %336 = vrot.lane.b32.xlu1 %v2773_v56, %s2979_s27 }
 0x3b2   :  { %v337_v58 = vpop.permute.xlu1 %336 }
 0x3b3   :  { %v339_v59 = vmul.f32 %v2771_v44, %v337_v58 }
 0x3b5   :  { %v340_v60 = vpack.c.bf16 %v339_v59, %v339_v59 }
 0x3b7   :  { %398 = vrot.lane.b32.xlu0 %v340_v60, %s2980_s30 }
 0x429   :  { %v399_v1 = vpop.permute.xlu0 %398 }
 0x42a   :  { %2501 = vmatmul.mubr.msk.bf16.vlgmr.msra.gmra.mrb[12].mxu1 %vm197_vm4, %v399_v1 }
 0x42b   :  { %2513 = vmatpush3.bf16.msra.mxu1 %v3103_v22  ;;  %2516 = vmatprep.mubr.msk.bf16.mxu1 %vm2977_vm0, %v2976_v2 }
 0x42c   :  { %2514 = vmatprep.subr.bf16.mxu1 %v2976_v2 }
 0x42f   :  { %2515 = vmatpush3.bf16.msra.mxu1 %v3110_v25 }
 0x430   :  { %2528 = vmatprep.subr.bf16.mxu1 %v2976_v2 }
 0x432   :  { %2517 = vmatmul.mubr.msk.bf16.vlgmr.msra.gmra.mrb[16].mxu1 %vm197_vm4, %v399_v1 }
 0x433   :  { %2529 = vmatpush3.bf16.msra.mxu1 %v3162_v55  ;;  %2532 = vmatprep.mubr.msk.bf16.mxu1 %vm2977_vm0, %v2976_v2 }
 0x434   :  { %2530 = vmatprep.subr.bf16.mxu1 %v2976_v2 }
 0x437   :  { %2531 = vmatpush3.bf16.msra.mxu1 %v3171_v57 }
 0x438   :  { %2544 = vmatprep.subr.bf16.mxu1 %v2976_v2 }
 0x4fd   :  { %v449_v4 = vpop.f32.mrb[12].mxu1 }
 0x4fe   :  { %v450_v5 = vadd.f32 %v449_v4, %v391_v61  ;;  %v2502_v6 = vpop.f32.mrb[13].mxu1 }
 0x4ff   :  { %v452_v7 = vpop.f32.mrb[14].mxu1 }
 0x500   :  { %v461_v8 = vadd.f32 %v3196_v3, %v450_v5  ;;  %v2503_v9 = vpop.f32.mrb[15].mxu1 }
 0x502   :  { %2774 = vtanh.f32 %v461_v8  ;;  %v2297_v21 = vmul.f32 -1.442695, %v461_v8 }
 0x505   :  { %v590_v10 = vpop.f32.mrb[16].mxu1 }
 0x506   :  { %v597_v11 = vrot.slane %v590_v10, 6  ;;  %v2518_v12 = vpop.f32.mrb[17].mxu1 }
 0x507   :  { %v593_v13 = vpop.f32.mrb[18].mxu1 }
 0x508   :  { %v599_v14 = vadd.f32 %v597_v11, %v3123_v28  ;;  %v2519_v15 = vpop.f32.mrb[19].mxu1 }
 0x50a   :  { %v600_v16 = vadd.f32 %v3130_v32, %v599_v14 }
 0x50c   :  { %v2775_v17 = vpop.eup %2774  ;;  %2776 = vtanh.f32 %v600_v16  ;;  %v2303_v20 = vmul.f32 -1.442695, %v600_v16 }
 0x50d   :  { %475 = vrot.lane.b32.xlu0 %v2775_v17, %s2979_s27 }
 0x50e   :  { %2778 = vpow2.f32 %v2303_v20 }
 0x50f   :  { %2780 = vpow2.f32 %v2297_v21 }
 0x511   :  { %470 = vrot.lane.b32.xlu0 %v2284_v18, %s2980_s30 }
 0x516   :  { %v2777_v19 = vpop.eup %2776 }
 0x517   :  { %613 = vrot.lane.b32.xlu1 %v2777_v19, %s2979_s27 }
 0x518   :  { %v2779_v23 = vpop.eup %2778 }
 0x519   :  { %v604_v24 = vadd.f32 1.0, %v2779_v23  ;;  %v2781_v26 = vpop.eup %2780 }
 0x51a   :  { %v465_v27 = vadd.f32 1.0, %v2781_v26 }
 0x51b   :  { %2782 = vrcp.f32 %v604_v24 }
 0x51c   :  { %2784 = vrcp.f32 %v465_v27 }
 0x525   :  { %v2783_v29 = vpop.eup %2782 }
 0x526   :  { %v2785_v35 = vpop.eup %2784  ;;  %v611_v38 = vmul.f32 %v2783_v29, %v609_v37 }
 0x57f   :  { %v476_v34 = vpop.permute.xlu0 %475 }
 0x580   :  { %v478_v36 = vmul.f32 %v2785_v35, %v476_v34 }
 0x583   :  { %v471_v39 = vpop.permute.xlu0 %470 }
 0x584   :  { %v473_v42 = vmul.f32 %v2785_v35, %v471_v39 }
 0x589   :  { %v614_v31 = vpop.permute.xlu1 %613 }
 0x58a   :  { %v616_v33 = vmul.f32 %v2783_v29, %v614_v31 }
 0x58c   :  { %618 = vrot.lane.b32.xlu1 %v616_v33, %s2980_s30 }
 0x590   :  { %480 = vrot.lane.b32.xlu1 %v478_v36, %s2980_s30 }
 0x5fe   :  { %v619_v40 = vpop.permute.xlu1 %618 }
 0x5ff   :  { %v3210_v41 = vadd.f32 %v619_v40, %v611_v38 }
 0x601   :  { %2786 = vtanh.f32 %v3210_v41 }
 0x602   :  { %v481_v43 = vpop.permute.xlu1 %480 }
 0x603   :  { %v3213_v44 = vadd.f32 %v481_v43, %v473_v42  ;;  %v843_v43 = vrot.slane %v3210_v41, 6 }
 0x605   :  { %2788 = vtanh.f32 %v3213_v44 }
 0x60b   :  { %v2787_v47 = vpop.eup %2786 }
 0x60c   :  { %624 = vrot.lane.b32.xlu0 %v2787_v47, %s2979_s27 }
 0x60f   :  { %v2789_v48 = vpop.eup %2788 }
 0x610   :  { %486 = vrot.lane.b32.xlu1 %v2789_v48, %s2979_s27 }
 0x67e   :  { %v625_v49 = vpop.permute.xlu0 %624 }
 0x67f   :  { %v627_v50 = vmul.f32 %v2783_v29, %v625_v49 }
 0x681   :  { %v628_v53 = vpack.c.bf16 %v627_v50, %v627_v50 }
 0x682   :  { %v487_v54 = vpop.permute.xlu1 %486 }
 0x683   :  { %v670_v56 = vrot.slane %v628_v53, 1  ;;  %v489_v58 = vmul.f32 %v2785_v35, %v487_v54 }
 0x685   :  { %v490_v59 = vpack.c.bf16 %v489_v58, %v489_v58  ;;  %671 = vrot.lane.b32.xlu0 %v670_v56, %s2980_s30 }
 0x687   :  { %498 = vrot.lane.b32.xlu1 %v490_v59, %s2980_s30 }
 0x6f7   :  { %v672_v60 = vpop.permute.xlu0 %671 }
 0x6f8   :  { %2533 = vmatmul.mubr.msk.bf16.vlgmr.msra.gmra.mrb[20].mxu1 %vm197_vm4, %v672_v60 }
 0x6f9   :  { %2545 = vmatpush3.bf16.msra.mxu1 %v3103_v22  ;;  %v499_v61 = vpop.permute.xlu1 %498  ;;  %2548 = vmatprep.mubr.msk.bf16.mxu1 %vm2977_vm0, %v2976_v2 }
 0x6fa   :  { %2509 = vmatmul.mubr.msk.bf16.vlgmr.msra.gmra.mrb[4].mxu0 %vm197_vm4, %v499_v61  ;;  %2546 = vmatprep.subr.bf16.mxu1 %v2976_v2 }
 0x6fb   :  { %2521 = vmatpush3.bf16.msra.mxu0 %v3146_v51  ;;  %2524 = vmatprep.mubr.msk.bf16.mxu0 %vm2977_vm0, %v2976_v2 }
 0x6fc   :  { %2522 = vmatprep.subr.bf16.mxu0 %v2976_v2 }
 0x6fd   :  { %2547 = vmatpush3.bf16.msra.mxu1 %v3110_v25 }
 0x6fe   :  { %2560 = vmatprep.subr.bf16.mxu1 %v2976_v2 }
 0x6ff   :  { %2523 = vmatpush3.bf16.msra.mxu0 %v3152_v52 }
 0x700   :  { %2549 = vmatmul.mubr.msk.bf16.vlgmr.msra.gmra.mrb[24].mxu1 %vm197_vm4, %v672_v60  ;;  %2536 = vmatprep.subr.bf16.mxu0 %v2976_v2 }
 0x701   :  { %2561 = vmatpush3.bf16.msra.mxu1 %v3162_v55  ;;  %2564 = vmatprep.mubr.msk.bf16.mxu1 %vm2977_vm0, %v2976_v2 }
 0x702   :  { %2525 = vmatmul.mubr.msk.bf16.vlgmr.msra.gmra.mrb[8].mxu0 %vm197_vm4, %v499_v61  ;;  %2562 = vmatprep.subr.bf16.mxu1 %v2976_v2 }
 0x703   :  { %2537 = vmatpush3.bf16.msra.mxu0 %v3219_v45  ;;  %2540 = vmatprep.mubr.msk.bf16.mxu0 %vm2977_vm0, %v2976_v2 }
 0x704   :  { %2538 = vmatprep.subr.bf16.mxu0 %v2976_v2 }
 0x705   :  { %2563 = vmatpush3.bf16.msra.mxu1 %v3171_v57 }
 0x706   :  { %2576 = vmatprep.subr.bf16.mxu1 %v2976_v2 }
 0x707   :  { %2539 = vmatpush3.bf16.msra.mxu0 %v3225_v46 }
 0x708   :  { %2552 = vmatprep.subr.bf16.mxu0 %v2976_v2 }
 0x7cb   :  { %v710_v62 = vpop.f32.mrb[20].mxu1 }
 0x7cc   :  { %v2534_v0 = vpop.f32.mrb[21].mxu1 }
 0x7cd   :  { %v549_v1 = vpop.f32.mrb[4].mxu0  ;;  %v713_v4 = vpop.f32.mrb[22].mxu1 }
 0x7ce   :  { %v550_v5 = vadd.f32 %v3265_v63, %v549_v1  ;;  %v2510_v6 = vpop.f32.mrb[5].mxu0  ;;  %v2535_v7 = vpop.f32.mrb[23].mxu1 }
 0x7cf   :  { %v552_v8 = vpop.f32.mrb[6].mxu0 }
 0x7d0   :  { %555 = vst [vmem:[#allocation2] sm:$0x3] %v550_v5  ;;  %v2511_v9 = vpop.f32.mrb[7].mxu0 }
 0x7d3   :  { %v824_v10 = vpop.f32.mrb[24].mxu1 }
 0x7d4   :  { %v831_v11 = vrot.slane %v824_v10, 4  ;;  %v2550_v12 = vpop.f32.mrb[25].mxu1 }
 0x7d5   :  { %v663_v13 = vpop.f32.mrb[8].mxu0  ;;  %v827_v14 = vpop.f32.mrb[26].mxu1 }
 0x7d6   :  { %v833_v15 = vadd.f32 %v831_v11, %v3123_v28  ;;  %v711_v16 = vadd.f32 %v710_v62, %v663_v13  ;;  %v2526_v17 = vpop.f32.mrb[9].mxu0  ;;  %v2551_v18 = vpop.f32.mrb[27].mxu1 }
 0x7d7   :  { %v666_v19 = vpop.f32.mrb[10].mxu0 }
 0x7d8   :  { %v834_v20 = vadd.f32 %v3130_v32, %v833_v15  ;;  %v716_v21 = vadd.f32 %v3196_v3, %v711_v16  ;;  %v2527_v23 = vpop.f32.mrb[11].mxu0 }
 0x7da   :  { %2790 = vtanh.f32 %v834_v20  ;;  %v2309_v27 = vmul.f32 -1.442695, %v834_v20  ;;  %v2306_v29 = vmul.f32 -1.442695, %v716_v21 }
 0x7db   :  { %2792 = vtanh.f32 %v716_v21 }
 0x7dc   :  { %2794 = vpow2.f32 %v2309_v27 }
 0x7dd   :  { %2796 = vpow2.f32 %v2306_v29 }
 0x7e4   :  { %v2791_v24 = vpop.eup %2790 }
 0x7e5   :  { %v2793_v26 = vpop.eup %2792  ;;  %847 = vrot.lane.b32.xlu0 %v2791_v24, %s2979_s27 }
 0x7e6   :  { %726 = vrot.lane.b32.xlu1 %v2793_v26, %s2979_s27  ;;  %v2795_v31 = vpop.eup %2794 }
 0x7e7   :  { %v2797_v33 = vpop.eup %2796  ;;  %v838_v34 = vadd.f32 1.0, %v2795_v31 }
 0x7e8   :  { %v720_v35 = vadd.f32 1.0, %v2797_v33 }
 0x7e9   :  { %2798 = vrcp.f32 %v838_v34 }
 0x7ea   :  { %2800 = vrcp.f32 %v720_v35 }
 0x7f3   :  { %v2799_v36 = vpop.eup %2798 }
 0x7f4   :  { %v2801_v38 = vpop.eup %2800  ;;  %v845_v47 = vmul.f32 %v2799_v36, %v843_v43 }
 0x7f5   :  { %v724_v48 = vmul.f32 %v2801_v38, %v3213_v44 }
 0x857   :  { %v848_v37 = vpop.permute.xlu0 %847 }
 0x858   :  { %v727_v39 = vpop.permute.xlu1 %726  ;;  %v850_v40 = vmul.f32 %v2799_v36, %v848_v37 }
 0x859   :  { %v729_v42 = vmul.f32 %v2801_v38, %v727_v39 }
 0x85a   :  { %852 = vrot.lane.b32.xlu0 %v850_v40, %s2980_s30 }
 0x85b   :  { %731 = vrot.lane.b32.xlu1 %v729_v42, %s2980_s30 }
 0x8cc   :  { %v853_v49 = vpop.permute.xlu0 %852 }
 0x8cd   :  { %v732_v50 = vpop.permute.xlu1 %731  ;;  %v3277_v53 = vadd.f32 %v853_v49, %v845_v47 }
 0x8ce   :  { %v3279_v54 = vadd.f32 %v732_v50, %v724_v48 }
 0x8cf   :  { %2802 = vtanh.f32 %v3277_v53  ;;  %v1077_v50 = vrot.slane %v3277_v53, 6 }
 0x8d0   :  { %2804 = vtanh.f32 %v3279_v54 }
 0x8d9   :  { %v2803_v56 = vpop.eup %2802 }
 0x8da   :  { %v2805_v58 = vpop.eup %2804  ;;  %858 = vrot.lane.b32.xlu0 %v2803_v56, %s2979_s27 }
 0x8db   :  { %737 = vrot.lane.b32.xlu1 %v2805_v58, %s2979_s27 }
 0x94c   :  { %v859_v41 = vpop.permute.xlu0 %858 }
 0x94d   :  { %v738_v59 = vpop.permute.xlu1 %737  ;;  %v861_v60 = vmul.f32 %v2799_v36, %v859_v41 }
 0x94e   :  { %v740_v44 = vmul.f32 %v2801_v38, %v738_v59 }
 0x94f   :  { %v862_v61 = vpack.c.bf16 %v861_v60, %v861_v60 }
 0x950   :  { %v741_v62 = vpack.c.bf16 %v740_v44, %v740_v44 }
 0x951   :  { %v904_v0 = vrot.slane %v862_v61, 2 }
 0x952   :  { %743 = vrot.lane.b32.xlu1 %v741_v62, %s2980_s30 }
 0x953   :  { %905 = vrot.lane.b32.xlu0 %v904_v0, %s2980_s30 }
 0x9c4   :  { %v744_v1 = vpop.permute.xlu1 %743 }
 0x9c5   :  { %2541 = vmatmul.mubr.msk.bf16.vlgmr.msra.gmra.mrb[12].mxu0 %vm197_vm4, %v744_v1  ;;  %v906_v4 = vpop.permute.xlu0 %905 }
 0x9c6   :  { %2553 = vmatpush3.bf16.msra.mxu0 %v3146_v51  ;;  %2565 = vmatmul.mubr.msk.bf16.vlgmr.msra.gmra.mrb[28].mxu1 %vm197_vm4, %v906_v4 }
 0x9c7   :  { %2577 = vmatpush3.bf16.msra.mxu1 %v3103_v22  ;;  %2554 = vmatprep.subr.bf16.mxu0 %v2976_v2 }
 0x9c8   :  { %2578 = vmatprep.subr.bf16.mxu1 %v2976_v2  ;;  %2556 = vmatprep.mubr.msk.bf16.mxu0 %vm2977_vm0, %v2976_v2 }
 0x9c9   :  { %2580 = vmatprep.mubr.msk.bf16.mxu1 %vm2977_vm0, %v2976_v2 }
 0x9ca   :  { %2555 = vmatpush3.bf16.msra.mxu0 %v3152_v52 }
 0x9cb   :  { %2579 = vmatpush3.bf16.msra.mxu1 %v3110_v25  ;;  %2568 = vmatprep.subr.bf16.mxu0 %v2976_v2 }
 0x9cc   :  { %2592 = vmatprep.subr.bf16.mxu1 %v2976_v2 }
 0x9cd   :  { %2557 = vmatmul.mubr.msk.bf16.vlgmr.msra.gmra.mrb[16].mxu0 %vm197_vm4, %v744_v1 }
 0x9ce   :  { %2581 = vmatmul.mubr.msk.bf16.vlgmr.msra.gmra.mrb[32].mxu1 %vm197_vm4, %v906_v4  ;;  %2569 = vmatpush3.bf16.msra.mxu0 %v3219_v45 }
 0x9cf   :  { %2570 = vmatprep.subr.bf16.mxu0 %v2976_v2  ;;  %2593 = vmatpush3.bf16.msra.mxu1 %v3162_v55 }
 0x9d0   :  { %2572 = vmatprep.mubr.msk.bf16.mxu0 %vm2977_vm0, %v2976_v2  ;;  %2594 = vmatprep.subr.bf16.mxu1 %v2976_v2 }
 0x9d1   :  { %2596 = vmatprep.mubr.msk.bf16.mxu1 %vm2977_vm0, %v2976_v2 }
 0x9d2   :  { %2571 = vmatpush3.bf16.msra.mxu0 %v3225_v46 }
 0x9d3   :  { %2584 = vmatprep.subr.bf16.mxu0 %v2976_v2  ;;  %2595 = vmatpush3.bf16.msra.mxu1 %v3171_v57 }
 0x9d4   :  { %2608 = vmatprep.subr.bf16.mxu1 %v2976_v2 }
 0xa98   :  { %v782_v5 = vpop.f32.mrb[12].mxu0 }
 0xa99   :  { %v783_v6 = vadd.f32 %v3265_v63, %v782_v5  ;;  %v2542_v7 = vpop.f32.mrb[13].mxu0  ;;  %v944_v8 = vpop.f32.mrb[28].mxu1 }
 0xa9a   :  { %v785_v9 = vpop.f32.mrb[14].mxu0  ;;  %v2566_v10 = vpop.f32.mrb[29].mxu1 }
 0xa9b   :  { %789 = vst [vmem:[#allocation2 + $0x2] sm:$0x3] %v783_v6  ;;  %v2543_v11 = vpop.f32.mrb[15].mxu0  ;;  %v947_v12 = vpop.f32.mrb[30].mxu1 }
 0xa9c   :  { %v2567_v13 = vpop.f32.mrb[31].mxu1 }
 0xaa0   :  { %v897_v14 = vpop.f32.mrb[16].mxu0 }
 0xaa1   :  { %v945_v15 = vadd.f32 %v944_v8, %v897_v14  ;;  %v2558_v16 = vpop.f32.mrb[17].mxu0  ;;  %v1058_v17 = vpop.f32.mrb[32].mxu1 }
 0xaa2   :  { %v900_v18 = vpop.f32.mrb[18].mxu0  ;;  %v1065_v19 = vrot.slane %v1058_v17, 2  ;;  %v2582_v20 = vpop.f32.mrb[33].mxu1 }
 0xaa3   :  { %v950_v21 = vadd.f32 %v3196_v3, %v945_v15  ;;  %v2559_v23 = vpop.f32.mrb[19].mxu0  ;;  %v1061_v24 = vpop.f32.mrb[34].mxu1 }
 0xaa4   :  { %v1067_v26 = vadd.f32 %v1065_v19, %v3123_v28  ;;  %v2583_v27 = vpop.f32.mrb[35].mxu1 }
 0xaa5   :  { %2806 = vtanh.f32 %v950_v21  ;;  %v2312_v34 = vmul.f32 -1.442695, %v950_v21 }
 0xaa6   :  { %v1068_v29 = vadd.f32 %v3130_v32, %v1067_v26 }
 0xaa8   :  { %2808 = vtanh.f32 %v1068_v29  ;;  %v2315_v35 = vmul.f32 -1.442695, %v1068_v29 }
 0xaa9   :  { %2810 = vpow2.f32 %v2312_v34 }
 0xaaa   :  { %2812 = vpow2.f32 %v2315_v35 }
 0xaaf   :  { %v2807_v31 = vpop.eup %2806 }
 0xab0   :  { %960 = vrot.lane.b32.xlu1 %v2807_v31, %s2979_s27 }
 0xab2   :  { %v2809_v33 = vpop.eup %2808 }
 0xab3   :  { %1081 = vrot.lane.b32.xlu0 %v2809_v33, %s2979_s27  ;;  %v2811_v36 = vpop.eup %2810 }
 0xab4   :  { %v2813_v37 = vpop.eup %2812  ;;  %v954_v38 = vadd.f32 1.0, %v2811_v36 }
 0xab5   :  { %v1072_v39 = vadd.f32 1.0, %v2813_v37 }
 0xab6   :  { %2814 = vrcp.f32 %v954_v38 }
 0xab7   :  { %2816 = vrcp.f32 %v1072_v39 }
 0xac0   :  { %v2815_v28 = vpop.eup %2814 }
 0xac1   :  { %v2817_v43 = vpop.eup %2816  ;;  %v958_v49 = vmul.f32 %v2815_v28, %v3279_v54 }
 0xac2   :  { %v1079_v41 = vmul.f32 %v2817_v43, %v1077_v50 }
 0xb22   :  { %v961_v40 = vpop.permute.xlu1 %960 }
 0xb23   :  { %v963_v42 = vmul.f32 %v2815_v28, %v961_v40 }
 0xb25   :  { %965 = vrot.lane.b32.xlu1 %v963_v42, %s2980_s30  ;;  %v1082_v47 = vpop.permute.xlu0 %1081 }
 0xb26   :  { %v1084_v48 = vmul.f32 %v2817_v43, %v1082_v47 }
 0xb28   :  { %1086 = vrot.lane.b32.xlu0 %v1084_v48, %s2980_s30 }
 0xb97   :  { %v966_v56 = vpop.permute.xlu1 %965 }
 0xb98   :  { %v3325_v58 = vadd.f32 %v966_v56, %v958_v49 }
 0xb9a   :  { %2818 = vtanh.f32 %v3325_v58  ;;  %v1087_v59 = vpop.permute.xlu0 %1086 }
 0xb9b   :  { %v3328_v60 = vadd.f32 %v1087_v59, %v1079_v41 }
 0xb9d   :  { %2820 = vtanh.f32 %v3328_v60 }
 0xba4   :  { %v2819_v44 = vpop.eup %2818 }
 0xba5   :  { %971 = vrot.lane.b32.xlu1 %v2819_v44, %s2979_s27  ;;  %v1308_v44 = vrot.slane %v3328_v60, 6 }
 0xba7   :  { %v2821_v61 = vpop.eup %2820 }
 0xba8   :  { %1092 = vrot.lane.b32.xlu0 %v2821_v61, %s2979_s27 }
 0xc17   :  { %v972_v54 = vpop.permute.xlu1 %971 }
 0xc18   :  { %v974_v62 = vmul.f32 %v2815_v28, %v972_v54 }
 0xc1a   :  { %v975_v53 = vpack.c.bf16 %v974_v62, %v974_v62  ;;  %v1093_v0 = vpop.permute.xlu0 %1092 }
 0xc1b   :  { %v1095_v1 = vmul.f32 %v2817_v43, %v1093_v0 }
 0xc1c   :  { %977 = vrot.lane.b32.xlu1 %v975_v53, %s2980_s30 }
 0xc1d   :  { %v1096_v4 = vpack.c.bf16 %v1095_v1, %v1095_v1 }
 0xc1f   :  { %v1138_v5 = vrot.slane %v1096_v4, 3 }
 0xc21   :  { %1139 = vrot.lane.b32.xlu0 %v1138_v5, %s2980_s30 }
 0xc8e   :  { %v978_v6 = vpop.permute.xlu1 %977 }
 0xc8f   :  { %2573 = vmatmul.mubr.msk.bf16.vlgmr.msra.gmra.mrb[20].mxu0 %vm197_vm4, %v978_v6 }
 0xc90   :  { %2585 = vmatpush3.bf16.msra.mxu0 %v3146_v51  ;;  %2588 = vmatprep.mubr.msk.bf16.mxu0 %vm2977_vm0, %v2976_v2 }
 0xc91   :  { %2586 = vmatprep.subr.bf16.mxu0 %v2976_v2 }
 0xc93   :  { %v1140_v7 = vpop.permute.xlu0 %1139 }
 0xc94   :  { %2587 = vmatpush3.bf16.msra.mxu0 %v3152_v52  ;;  %2597 = vmatmul.mubr.msk.bf16.vlgmr.msra.gmra.mrb[36].mxu1 %vm197_vm4, %v1140_v7 }
 0xc95   :  { %2609 = vmatpush3.bf16.msra.mxu1 %v3103_v22  ;;  %2612 = vmatprep.mubr.msk.bf16.mxu1 %vm2977_vm0, %v2976_v2 }
 0xc96   :  { %2610 = vmatprep.subr.bf16.mxu1 %v2976_v2  ;;  %2600 = vmatprep.subr.bf16.mxu0 %v2976_v2 }
 0xc97   :  { %2589 = vmatmul.mubr.msk.bf16.vlgmr.msra.gmra.mrb[24].mxu0 %vm197_vm4, %v978_v6 }
 0xc98   :  { %2601 = vmatpush3.bf16.msra.mxu0 %v3219_v45  ;;  %2604 = vmatprep.mubr.msk.bf16.mxu0 %vm2977_vm0, %v2976_v2 }
 0xc99   :  { %2611 = vmatpush3.bf16.msra.mxu1 %v3110_v25  ;;  %2602 = vmatprep.subr.bf16.mxu0 %v2976_v2 }
 0xc9a   :  { %2624 = vmatprep.subr.bf16.mxu1 %v2976_v2 }
 0xc9c   :  { %2613 = vmatmul.mubr.msk.bf16.vlgmr.msra.gmra.mrb[40].mxu1 %vm197_vm4, %v1140_v7  ;;  %2603 = vmatpush3.bf16.msra.mxu0 %v3225_v46 }
 0xc9d   :  { %2625 = vmatpush3.bf16.msra.mxu1 %v3162_v55  ;;  %2616 = vmatprep.subr.bf16.mxu0 %v2976_v2 }
 0xc9e   :  { %2626 = vmatprep.subr.bf16.mxu1 %v2976_v2  ;;  %2628 = vmatprep.mubr.msk.bf16.mxu1 %vm2977_vm0, %v2976_v2 }
 0xca1   :  { %2627 = vmatpush3.bf16.msra.mxu1 %v3171_v57 }
 0xca2   :  { %2640 = vmatprep.subr.bf16.mxu1 %v2976_v2 }
 0xd62   :  { %v1016_v8 = vpop.f32.mrb[20].mxu0 }
 0xd63   :  { %v1017_v9 = vadd.f32 %v3265_v63, %v1016_v8  ;;  %v2574_v10 = vpop.f32.mrb[21].mxu0 }
 0xd64   :  { %v1019_v11 = vpop.f32.mrb[22].mxu0 }
 0xd65   :  { %1023 = vst [vmem:[#allocation2 + $0x4] sm:$0x3] %v1017_v9  ;;  %v2575_v12 = vpop.f32.mrb[23].mxu0 }
 0xd67   :  { %v1178_v13 = vpop.f32.mrb[36].mxu1 }
 0xd68   :  { %v2598_v14 = vpop.f32.mrb[37].mxu1 }
 0xd69   :  { %v1181_v15 = vpop.f32.mrb[38].mxu1 }
 0xd6a   :  { %v1131_v16 = vpop.f32.mrb[24].mxu0  ;;  %v2599_v17 = vpop.f32.mrb[39].mxu1 }
 0xd6b   :  { %v1179_v18 = vadd.f32 %v1178_v13, %v1131_v16  ;;  %v2590_v19 = vpop.f32.mrb[25].mxu0 }
 0xd6c   :  { %v1134_v20 = vpop.f32.mrb[26].mxu0 }
 0xd6d   :  { %v1184_v21 = vadd.f32 %v3196_v3, %v1179_v18  ;;  %v2591_v23 = vpop.f32.mrb[27].mxu0 }
 0xd6f   :  { %2822 = vtanh.f32 %v1184_v21  ;;  %v1292_v24 = vpop.f32.mrb[40].mxu1  ;;  %v2318_v36 = vmul.f32 -1.442695, %v1184_v21 }
 0xd70   :  { %v1298_v26 = vadd.f32 %v1292_v24, %v3125_v30  ;;  %v2614_v27 = vpop.f32.mrb[41].mxu1 }
 0xd71   :  { %v1295_v29 = vpop.f32.mrb[42].mxu1 }
 0xd72   :  { %v1299_v31 = vadd.f32 %v3130_v32, %v1298_v26  ;;  %v2615_v33 = vpop.f32.mrb[43].mxu1 }
 0xd74   :  { %2824 = vtanh.f32 %v1299_v31  ;;  %v2321_v37 = vmul.f32 -1.442695, %v1299_v31 }
 0xd75   :  { %2826 = vpow2.f32 %v2318_v36 }
 0xd76   :  { %2828 = vpow2.f32 %v2321_v37 }
 0xd79   :  { %v2823_v34 = vpop.eup %2822 }
 0xd7a   :  { %1194 = vrot.lane.b32.xlu1 %v2823_v34, %s2979_s27 }
 0xd7e   :  { %v2825_v35 = vpop.eup %2824 }
 0xd7f   :  { %1312 = vrot.lane.b32.xlu0 %v2825_v35, %s2979_s27  ;;  %v2827_v38 = vpop.eup %2826 }
 0xd80   :  { %v1188_v39 = vadd.f32 1.0, %v2827_v38  ;;  %v2829_v28 = vpop.eup %2828 }
 0xd81   :  { %v1303_v40 = vadd.f32 1.0, %v2829_v28 }
 0xd82   :  { %2830 = vrcp.f32 %v1188_v39 }
 0xd83   :  { %2832 = vrcp.f32 %v1303_v40 }
 0xd8c   :  { %v2831_v42 = vpop.eup %2830 }
 0xd8d   :  { %v2833_v48 = vpop.eup %2832  ;;  %v1192_v56 = vmul.f32 %v2831_v42, %v3325_v58 }
 0xd8e   :  { %v1310_v61 = vmul.f32 %v2833_v48, %v1308_v44 }
 0xdec   :  { %v1195_v43 = vpop.permute.xlu1 %1194 }
 0xded   :  { %v1197_v47 = vmul.f32 %v2831_v42, %v1195_v43 }
 0xdef   :  { %1199 = vrot.lane.b32.xlu1 %v1197_v47, %s2980_s30 }
 0xdf1   :  { %v1313_v49 = vpop.permute.xlu0 %1312 }
 0xdf2   :  { %v1315_v50 = vmul.f32 %v2833_v48, %v1313_v49 }
 0xdf4   :  { %1317 = vrot.lane.b32.xlu0 %v1315_v50, %s2980_s30 }
 0xe61   :  { %v1200_v41 = vpop.permute.xlu1 %1199 }
 0xe62   :  { %v3372_v59 = vadd.f32 %v1200_v41, %v1192_v56 }
 0xe64   :  { %2834 = vtanh.f32 %v3372_v59 }
 0xe66   :  { %v1318_v54 = vpop.permute.xlu0 %1317 }
 0xe67   :  { %v3376_v62 = vadd.f32 %v1318_v54, %v1310_v61 }
 0xe69   :  { %2836 = vtanh.f32 %v3376_v62  ;;  %v1541_v44 = vrot.slane %v3376_v62, 6 }
 0xe6e   :  { %v2835_v53 = vpop.eup %2834 }
 0xe6f   :  { %1205 = vrot.lane.b32.xlu1 %v2835_v53, %s2979_s27 }
 0xe73   :  { %v2837_v0 = vpop.eup %2836 }
 0xe74   :  { %1323 = vrot.lane.b32.xlu0 %v2837_v0, %s2979_s27 }
 0xee1   :  { %v1206_v58 = vpop.permute.xlu1 %1205 }
 0xee2   :  { %v1208_v1 = vmul.f32 %v2831_v42, %v1206_v58 }
 0xee4   :  { %v1209_v4 = vpack.c.bf16 %v1208_v1, %v1208_v1 }
 0xee6   :  { %1211 = vrot.lane.b32.xlu1 %v1209_v4, %s2980_s30  ;;  %v1324_v60 = vpop.permute.xlu0 %1323 }
 0xee7   :  { %v1326_v5 = vmul.f32 %v2833_v48, %v1324_v60 }
 0xee9   :  { %v1327_v6 = vpack.c.bf16 %v1326_v5, %v1326_v5 }
 0xeeb   :  { %1369 = vrot.lane.b32.xlu0 %v1327_v6, %s2980_s30 }
 0xf58   :  { %v1212_v7 = vpop.permute.xlu1 %1211 }
 0xf59   :  { %2605 = vmatmul.mubr.msk.bf16.vlgmr.msra.gmra.mrb[28].mxu0 %vm197_vm4, %v1212_v7 }
 0xf5a   :  { %2617 = vmatpush3.bf16.msra.mxu0 %v3146_v51  ;;  %2620 = vmatprep.mubr.msk.bf16.mxu0 %vm2977_vm0, %v2976_v2 }
 0xf5b   :  { %2618 = vmatprep.subr.bf16.mxu0 %v2976_v2 }
 0xf5d   :  { %v1370_v8 = vpop.permute.xlu0 %1369 }
 0xf5e   :  { %2619 = vmatpush3.bf16.msra.mxu0 %v3152_v52  ;;  %2629 = vmatmul.mubr.msk.bf16.vlgmr.msra.gmra.mrb[44].mxu1 %vm197_vm4, %v1370_v8 }
 0xf5f   :  { %2641 = vmatpush3.bf16.msra.mxu1 %v3103_v22  ;;  %2644 = vmatprep.mubr.msk.bf16.mxu1 %vm2977_vm0, %v2976_v2 }
 0xf60   :  { %2642 = vmatprep.subr.bf16.mxu1 %v2976_v2  ;;  %2632 = vmatprep.subr.bf16.mxu0 %v2976_v2 }
 0xf61   :  { %2621 = vmatmul.mubr.msk.bf16.vlgmr.msra.gmra.mrb[32].mxu0 %vm197_vm4, %v1212_v7 }
 0xf62   :  { %2633 = vmatpush3.bf16.msra.mxu0 %v3219_v45  ;;  %2636 = vmatprep.mubr.msk.bf16.mxu0 %vm2977_vm0, %v2976_v2 }
 0xf63   :  { %2643 = vmatpush3.bf16.msra.mxu1 %v3110_v25  ;;  %2634 = vmatprep.subr.bf16.mxu0 %v2976_v2 }
 0xf64   :  { %2656 = vmatprep.subr.bf16.mxu1 %v2976_v2 }
 0xf66   :  { %2645 = vmatmul.mubr.msk.bf16.vlgmr.msra.gmra.mrb[48].mxu1 %vm197_vm4, %v1370_v8  ;;  %2635 = vmatpush3.bf16.msra.mxu0 %v3225_v46 }
 0xf67   :  { %2648 = vmatprep.subr.bf16.mxu0 %v2976_v2  ;;  %2657 = vmatpush3.bf16.msra.mxu1 %v3162_v55 }
 0xf68   :  { %2658 = vmatprep.subr.bf16.mxu1 %v2976_v2  ;;  %2660 = vmatprep.mubr.msk.bf16.mxu1 %vm2977_vm0, %v2976_v2 }
 0xf6b   :  { %2659 = vmatpush3.bf16.msra.mxu1 %v3171_v57 }
 0xf6c   :  { %2672 = vmatprep.subr.bf16.mxu1 %v2976_v2 }
0x102c   :  { %v1250_v22 = vpop.f32.mrb[28].mxu0 }
0x102d   :  { %v1251_v25 = vadd.f32 %v3265_v63, %v1250_v22  ;;  %v2606_v9 = vpop.f32.mrb[29].mxu0 }
0x102e   :  { %v1253_v10 = vpop.f32.mrb[30].mxu0 }
0x102f   :  { %1257 = vst [vmem:[#allocation2 + $0x6] sm:$0x3] %v1251_v25  ;;  %v2607_v11 = vpop.f32.mrb[31].mxu0 }
0x1031   :  { %v1408_v12 = vpop.f32.mrb[44].mxu1 }
0x1032   :  { %v2630_v13 = vpop.f32.mrb[45].mxu1 }
0x1033   :  { %v1411_v14 = vpop.f32.mrb[46].mxu1 }
0x1034   :  { %v1362_v15 = vpop.f32.mrb[32].mxu0  ;;  %v2631_v16 = vpop.f32.mrb[47].mxu1 }
0x1035   :  { %v1409_v17 = vadd.f32 %v1408_v12, %v1362_v15  ;;  %v2622_v18 = vpop.f32.mrb[33].mxu0 }
0x1036   :  { %v1365_v19 = vpop.f32.mrb[34].mxu0 }
0x1037   :  { %v1414_v20 = vadd.f32 %v3196_v3, %v1409_v17  ;;  %v2623_v21 = vpop.f32.mrb[35].mxu0 }
0x1039   :  { %2838 = vtanh.f32 %v1414_v20  ;;  %v1522_v23 = vpop.f32.mrb[48].mxu1  ;;  %v2324_v36 = vmul.f32 -1.442695, %v1414_v20 }
0x103a   :  { %v1529_v24 = vrot.slane %v1522_v23, 6  ;;  %v2646_v26 = vpop.f32.mrb[49].mxu1 }
0x103b   :  { %v1525_v27 = vpop.f32.mrb[50].mxu1 }
0x103c   :  { %v1531_v29 = vadd.f32 %v1529_v24, %v3125_v30  ;;  %v2647_v31 = vpop.f32.mrb[51].mxu1 }
0x103e   :  { %v1532_v33 = vadd.f32 %v3130_v32, %v1531_v29  ;;  %v3475_v29 = vld [vmem:[%s3644_s4] ss:$0 sm:$0xff] }
0x1040   :  { %2840 = vtanh.f32 %v1532_v33  ;;  %v2327_v37 = vmul.f32 -1.442695, %v1532_v33 }
0x1041   :  { %2842 = vpow2.f32 %v2324_v36 }
0x1042   :  { %2844 = vpow2.f32 %v2327_v37 }
0x1043   :  { %v2839_v34 = vpop.eup %2838 }
0x1044   :  { %1424 = vrot.lane.b32.xlu1 %v2839_v34, %s2979_s27 }
0x104a   :  { %v2841_v35 = vpop.eup %2840 }
0x104b   :  { %1545 = vrot.lane.b32.xlu0 %v2841_v35, %s2979_s27  ;;  %v2843_v38 = vpop.eup %2842 }
0x104c   :  { %v1418_v39 = vadd.f32 1.0, %v2843_v38  ;;  %v2845_v28 = vpop.eup %2844 }
0x104d   :  { %v1536_v40 = vadd.f32 1.0, %v2845_v28 }
0x104e   :  { %2846 = vrcp.f32 %v1418_v39 }
0x104f   :  { %2848 = vrcp.f32 %v1536_v40 }
0x1058   :  { %v2847_v42 = vpop.eup %2846 }
0x1059   :  { %v2849_v47 = vpop.eup %2848  ;;  %v1422_v50 = vmul.f32 %v2847_v42, %v3372_v59 }
0x105a   :  { %v1543_v61 = vmul.f32 %v2849_v47, %v1541_v44 }
0x10b6   :  { %v1425_v43 = vpop.permute.xlu1 %1424 }
0x10b7   :  { %v1427_v32 = vmul.f32 %v2847_v42, %v1425_v43 }
0x10b9   :  { %1429 = vrot.lane.b32.xlu1 %v1427_v32, %s2980_s30 }
0x10bd   :  { %v1546_v48 = vpop.permute.xlu0 %1545 }
0x10be   :  { %v1548_v49 = vmul.f32 %v2849_v47, %v1546_v48 }
0x10c0   :  { %1550 = vrot.lane.b32.xlu0 %v1548_v49, %s2980_s30 }
0x112b   :  { %v1430_v56 = vpop.permute.xlu1 %1429 }
0x112c   :  { %v3420_v41 = vadd.f32 %v1430_v56, %v1422_v50 }
0x112e   :  { %2850 = vtanh.f32 %v3420_v41 }
0x1132   :  { %v1551_v54 = vpop.permute.xlu0 %1550 }
0x1133   :  { %v3424_v53 = vadd.f32 %v1551_v54, %v1543_v61 }
0x1135   :  { %2852 = vtanh.f32 %v3424_v53  ;;  %v1775_v56 = vrot.slane %v3424_v53, 6 }
0x1138   :  { %v2851_v0 = vpop.eup %2850 }
0x1139   :  { %1435 = vrot.lane.b32.xlu1 %v2851_v0, %s2979_s27 }
0x113f   :  { %v2853_v58 = vpop.eup %2852 }
0x1140   :  { %1556 = vrot.lane.b32.xlu0 %v2853_v58, %s2979_s27 }
0x11ab   :  { %v1436_v59 = vpop.permute.xlu1 %1435 }
0x11ac   :  { %v1438_v1 = vmul.f32 %v2847_v42, %v1436_v59 }
0x11ae   :  { %v1439_v4 = vpack.c.bf16 %v1438_v1, %v1438_v1 }
0x11b0   :  { %1441 = vrot.lane.b32.xlu0 %v1439_v4, %s2980_s30 }
0x11b2   :  { %v1557_v60 = vpop.permute.xlu0 %1556 }
0x11b3   :  { %v1559_v5 = vmul.f32 %v2849_v47, %v1557_v60 }
0x11b5   :  { %v1560_v62 = vpack.c.bf16 %v1559_v5, %v1559_v5 }
0x11b7   :  { %v1602_v6 = vrot.slane %v1560_v62, 1 }
0x11b9   :  { %1603 = vrot.lane.b32.xlu1 %v1602_v6, %s2980_s30  ;;  %v3498_v6 = vld [vmem:[%s3643_s3 + $0x10] sm:$0xff]  }
0x1222   :  { %v1442_v7 = vpop.permute.xlu0 %1441 }
0x1223   :  { %2637 = vmatmul.mubr.msk.bf16.vlgmr.msra.gmra.mrb[36].mxu0 %vm197_vm4, %v1442_v7 }
0x1224   :  { %2649 = vmatpush3.bf16.msra.mxu0 %v3146_v51  ;;  %2652 = vmatprep.mubr.msk.bf16.mxu0 %vm2977_vm0, %v2976_v2  ;;  %v3444_v51 = vld [vmem:[%s3643_s3] sm:$0xff]  }
0x1225   :  { %2650 = vmatprep.subr.bf16.mxu0 %v2976_v2 }
0x1228   :  { %2651 = vmatpush3.bf16.msra.mxu0 %v3152_v52  ;;  %v3457_v52 = vld [vmem:[%s3643_s3 + $0x8] sm:$0xff]  }
0x1229   :  { %2664 = vmatprep.subr.bf16.mxu0 %v2976_v2 }
0x122b   :  { %2653 = vmatmul.mubr.msk.bf16.vlgmr.msra.gmra.mrb[40].mxu0 %vm197_vm4, %v1442_v7  ;;  %v1604_v8 = vpop.permute.xlu1 %1603  ;;  %v3507_v7 = vld [vmem:[%s3643_s3 + $0x18] sm:$0xff]  }
0x122c   :  { %2661 = vmatmul.mubr.msk.bf16.vlgmr.msra.gmra.mrb[52].mxu1 %vm197_vm4, %v1604_v8  ;;  %2665 = vmatpush3.bf16.msra.mxu0 %v3219_v45 }
0x122d   :  { %2673 = vmatpush3.bf16.msra.mxu1 %v3444_v51  ;;  %2676 = vmatprep.mubr.msk.bf16.mxu1 %vm2977_vm0, %v2976_v2 }
0x122e   :  { %2674 = vmatprep.subr.bf16.mxu1 %v2976_v2  ;;  %2666 = vmatprep.subr.bf16.mxu0 %v2976_v2 }
0x122f   :  { %2668 = vmatprep.mubr.msk.bf16.mxu0 %vm2977_vm0, %v2976_v2 }
0x1230   :  { %2667 = vmatpush3.bf16.msra.mxu0 %v3225_v46 }
0x1231   :  { %2675 = vmatpush3.bf16.msra.mxu1 %v3457_v52  ;;  %2680 = vmatprep.subr.bf16.mxu0 %v2976_v2 }
0x1232   :  { %2688 = vmatprep.subr.bf16.mxu1 %v2976_v2 }
0x1234   :  { %2677 = vmatmul.mubr.msk.bf16.vlgmr.msra.gmra.mrb[56].mxu1 %vm197_vm4, %v1604_v8 }
0x1235   :  { %2689 = vmatpush3.bf16.msra.mxu1 %v3162_v55  ;;  %2692 = vmatprep.mubr.msk.bf16.mxu1 %vm2977_vm0, %v2976_v2 }
0x1236   :  { %2690 = vmatprep.subr.bf16.mxu1 %v2976_v2 }
0x1239   :  { %2691 = vmatpush3.bf16.msra.mxu1 %v3171_v57 }
0x123a   :  { %2704 = vmatprep.subr.bf16.mxu1 %v2976_v2 }
0x12f6   :  { %v1480_v22 = vpop.f32.mrb[36].mxu0 }
0x12f7   :  { %v1481_v25 = vadd.f32 %v3265_v63, %v1480_v22  ;;  %v2638_v9 = vpop.f32.mrb[37].mxu0 }
0x12f8   :  { %v1483_v10 = vpop.f32.mrb[38].mxu0 }
0x12f9   :  { %1487 = vst [vmem:[#allocation2 + $0x8] sm:$0x3] %v1481_v25  ;;  %v2639_v11 = vpop.f32.mrb[39].mxu0 }
0x12fe   :  { %v1595_v12 = vpop.f32.mrb[40].mxu0 }
0x12ff   :  { %v2654_v13 = vpop.f32.mrb[41].mxu0  ;;  %v1642_v14 = vpop.f32.mrb[52].mxu1 }
0x1300   :  { %v1598_v55 = vpop.f32.mrb[42].mxu0  ;;  %v1643_v15 = vadd.f32 %v1642_v14, %v1595_v12  ;;  %v2662_v16 = vpop.f32.mrb[53].mxu1 }
0x1301   :  { %v2655_v17 = vpop.f32.mrb[43].mxu0  ;;  %v1645_v18 = vpop.f32.mrb[54].mxu1 }
0x1302   :  { %v1648_v19 = vadd.f32 %v3196_v3, %v1643_v15  ;;  %v2663_v57 = vpop.f32.mrb[55].mxu1  ;;  %v3539_v17 = vld [vmem:[%s3644_s4 + $0x1] ss:$0 sm:$0xff] }
0x1304   :  { %2854 = vtanh.f32 %v1648_v19  ;;  %v2330_v34 = vmul.f32 -1.442695, %v1648_v19 }
0x1307   :  { %v1756_v20 = vpop.f32.mrb[56].mxu1 }
0x1308   :  { %v1763_v21 = vrot.slane %v1756_v20, 4  ;;  %v2678_v23 = vpop.f32.mrb[57].mxu1 }
0x1309   :  { %v1759_v24 = vpop.f32.mrb[58].mxu1 }
0x130a   :  { %v1765_v26 = vadd.f32 %v1763_v21, %v3125_v30  ;;  %v2679_v27 = vpop.f32.mrb[59].mxu1 }
0x130c   :  { %v1766_v31 = vadd.f32 %v3475_v29, %v1765_v26 }
0x130e   :  { %v2855_v33 = vpop.eup %2854  ;;  %2856 = vtanh.f32 %v1766_v31  ;;  %v2333_v35 = vmul.f32 -1.442695, %v1766_v31 }
0x130f   :  { %1658 = vrot.lane.b32.xlu0 %v2855_v33, %s2979_s27  ;;  %2858 = vpow2.f32 %v2330_v34 }
0x1310   :  { %2860 = vpow2.f32 %v2333_v35 }
0x1318   :  { %v2857_v3 = vpop.eup %2856 }
0x1319   :  { %1779 = vrot.lane.b32.xlu1 %v2857_v3, %s2979_s27  ;;  %v2859_v36 = vpop.eup %2858 }
0x131a   :  { %v1652_v37 = vadd.f32 1.0, %v2859_v36  ;;  %v2861_v38 = vpop.eup %2860 }
0x131b   :  { %v1770_v39 = vadd.f32 1.0, %v2861_v38 }
0x131c   :  { %2862 = vrcp.f32 %v1652_v37 }
0x131d   :  { %2864 = vrcp.f32 %v1770_v39 }
0x1326   :  { %v2863_v28 = vpop.eup %2862 }
0x1327   :  { %v2865_v43 = vpop.eup %2864  ;;  %v1656_v48 = vmul.f32 %v2863_v28, %v3420_v41 }
0x1328   :  { %v1777_v44 = vmul.f32 %v2865_v43, %v1775_v56 }
0x1381   :  { %v1659_v40 = vpop.permute.xlu0 %1658 }
0x1382   :  { %v1661_v42 = vmul.f32 %v2863_v28, %v1659_v40 }
0x1384   :  { %1663 = vrot.lane.b32.xlu0 %v1661_v42, %s2980_s30 }
0x138b   :  { %v1780_v32 = vpop.permute.xlu1 %1779 }
0x138c   :  { %v1782_v47 = vmul.f32 %v2865_v43, %v1780_v32 }
0x138e   :  { %1784 = vrot.lane.b32.xlu1 %v1782_v47, %s2980_s30 }
0x13f6   :  { %v1664_v49 = vpop.permute.xlu0 %1663 }
0x13f7   :  { %v3483_v50 = vadd.f32 %v1664_v49, %v1656_v48 }
0x13f9   :  { %2866 = vtanh.f32 %v3483_v50 }
0x1400   :  { %v1785_v61 = vpop.permute.xlu1 %1784 }
0x1401   :  { %v3487_v54 = vadd.f32 %v1785_v61, %v1777_v44 }
0x1403   :  { %v2867_v0 = vpop.eup %2866  ;;  %2868 = vtanh.f32 %v3487_v54  ;;  %v2009_v47 = vrot.slane %v3487_v54, 6 }
0x1404   :  { %1669 = vrot.lane.b32.xlu0 %v2867_v0, %s2979_s27 }
0x140d   :  { %v2869_v58 = vpop.eup %2868 }
0x140e   :  { %1790 = vrot.lane.b32.xlu1 %v2869_v58, %s2979_s27 }
0x1476   :  { %v1670_v41 = vpop.permute.xlu0 %1669 }
0x1477   :  { %v1672_v59 = vmul.f32 %v2863_v28, %v1670_v41 }
0x1479   :  { %v1673_v1 = vpack.c.bf16 %v1672_v59, %v1672_v59 }
0x147b   :  { %1675 = vrot.lane.b32.xlu0 %v1673_v1, %s2980_s30 }
0x1480   :  { %v1791_v4 = vpop.permute.xlu1 %1790 }
0x1481   :  { %v1793_v60 = vmul.f32 %v2865_v43, %v1791_v4 }
0x1483   :  { %v1794_v53 = vpack.c.bf16 %v1793_v60, %v1793_v60  ;;  %v2902_v60 = vld [vmem:[%s3647_s7] sm:$0xff]  }
0x1485   :  { %v1836_v5 = vrot.slane %v1794_v53, 2 }
0x1487   :  { %1837 = vrot.lane.b32.xlu1 %v1836_v5, %s2980_s30  ;;  %v2903_v5 = vld [vmem:[%s3647_s7 + $0x8] sm:$0xff]   ;;  %s2981_s7 = smov 96  }
0x14ed   :  { %v1676_v62 = vpop.permute.xlu0 %1675 }
0x14ee   :  { %2669 = vmatmul.mubr.msk.bf16.vlgmr.msra.gmra.mrb[44].mxu0 %vm197_vm4, %v1676_v62 }
0x14ef   :  { %2681 = vmatpush3.bf16.msra.mxu0 %v3498_v6  ;;  %2684 = vmatprep.mubr.msk.bf16.mxu0 %vm2977_vm0, %v2976_v2 }
0x14f0   :  { %2682 = vmatprep.subr.bf16.mxu0 %v2976_v2 }
0x14f3   :  { %2683 = vmatpush3.bf16.msra.mxu0 %v3507_v7 }
0x14f4   :  { %2696 = vmatprep.subr.bf16.mxu0 %v2976_v2 }
0x14f6   :  { %2685 = vmatmul.mubr.msk.bf16.vlgmr.msra.gmra.mrb[48].mxu0 %vm197_vm4, %v1676_v62 }
0x14f7   :  { %2697 = vmatpush3.bf16.msra.mxu0 %v3219_v45  ;;  %2700 = vmatprep.mubr.msk.bf16.mxu0 %vm2977_vm0, %v2976_v2  ;;  %v2899_v45 = vld [vmem:[%s3642_s2 + $0x10] sm:$0xff]  }
0x14f8   :  { %2698 = vmatprep.subr.bf16.mxu0 %v2976_v2 }
0x14f9   :  { %v1838_v8 = vpop.permute.xlu1 %1837 }
0x14fa   :  { %2693 = vmatmul.mubr.msk.bf16.vlgmr.msra.gmra.mrb[60].mxu1 %vm197_vm4, %v1838_v8 }
0x14fb   :  { %2705 = vmatpush3.bf16.msra.mxu1 %v3444_v51  ;;  %2708 = vmatprep.mubr.msk.bf16.mxu1 %vm2977_vm0, %v2976_v2 }
0x14fc   :  { %2706 = vmatprep.subr.bf16.mxu1 %v2976_v2  ;;  %2699 = vmatpush3.bf16.msra.mxu0 %v3225_v46  ;;  %v2900_v46 = vld [vmem:[%s3642_s2 + $0x18] sm:$0xff]  }
0x14fd   :  { %2712 = vmatprep.subr.bf16.mxu0 %v2976_v2 }
0x14ff   :  { %2707 = vmatpush3.bf16.msra.mxu1 %v3457_v52 }
0x1500   :  { %2720 = vmatprep.subr.bf16.mxu1 %v2976_v2 }
0x1502   :  { %2709 = vmatmul.mubr.msk.bf16.vlgmr.msra.gmra.mrb[64].mxu1 %vm197_vm4, %v1838_v8 }
0x1503   :  { %2721 = vmatpush3.bf16.msra.mxu1 %v2899_v45  ;;  %2724 = vmatprep.mubr.msk.bf16.mxu1 %vm2977_vm0, %v2976_v2 }
0x1504   :  { %2722 = vmatprep.subr.bf16.mxu1 %v2976_v2 }
0x1507   :  { %2723 = vmatpush3.bf16.msra.mxu1 %v2900_v46 }
0x15c1   :  { %v1714_v51 = vpop.f32.mrb[44].mxu0 }
0x15c2   :  { %v1715_v52 = vadd.f32 %v3265_v63, %v1714_v51  ;;  %v2670_v22 = vpop.f32.mrb[45].mxu0 }
0x15c3   :  { %v1717_v25 = vpop.f32.mrb[46].mxu0 }
0x15c4   :  { %1721 = vst [vmem:[#allocation2 + $0xa] sm:$0x3] %v1715_v52  ;;  %v2671_v9 = vpop.f32.mrb[47].mxu0 }
0x15c9   :  { %v1829_v10 = vpop.f32.mrb[48].mxu0 }
0x15ca   :  { %v2686_v11 = vpop.f32.mrb[49].mxu0 }
0x15cb   :  { %v1832_v12 = vpop.f32.mrb[50].mxu0 }
0x15cc   :  { %v2687_v13 = vpop.f32.mrb[51].mxu0 }
0x15cd   :  { %v1876_v14 = vpop.f32.mrb[60].mxu1 }
0x15ce   :  { %v1877_v55 = vadd.f32 %v1876_v14, %v1829_v10  ;;  %v2694_v15 = vpop.f32.mrb[61].mxu1 }
0x15cf   :  { %v1879_v16 = vpop.f32.mrb[62].mxu1 }
0x15d0   :  { %v1882_v18 = vadd.f32 %v3539_v17, %v1877_v55  ;;  %v2695_v63 = vpop.f32.mrb[63].mxu1 }
0x15d2   :  { %2870 = vtanh.f32 %v1882_v18  ;;  %v2336_v33 = vmul.f32 -1.442695, %v1882_v18 }
0x15d5   :  { %v1990_v19 = vpop.f32.mrb[64].mxu1 }
0x15d6   :  { %v1997_v57 = vrot.slane %v1990_v19, 2  ;;  %v2710_v20 = vpop.f32.mrb[65].mxu1 }
0x15d7   :  { %v1993_v21 = vpop.f32.mrb[66].mxu1 }
0x15d8   :  { %v1999_v23 = vadd.f32 %v1997_v57, %v3125_v30  ;;  %v2711_v24 = vpop.f32.mrb[67].mxu1 }
0x15da   :  { %v2000_v26 = vadd.f32 %v3475_v29, %v1999_v23 }
0x15dc   :  { %v2871_v27 = vpop.eup %2870  ;;  %2872 = vtanh.f32 %v2000_v26  ;;  %v2339_v3 = vmul.f32 -1.442695, %v2000_v26 }
0x15dd   :  { %1892 = vrot.lane.b32.xlu0 %v2871_v27, %s2979_s27  ;;  %2874 = vpow2.f32 %v2336_v33 }
0x15de   :  { %2876 = vpow2.f32 %v2339_v3 }
0x15e6   :  { %v2873_v31 = vpop.eup %2872 }
0x15e7   :  { %2013 = vrot.lane.b32.xlu1 %v2873_v31, %s2979_s27  ;;  %v2875_v34 = vpop.eup %2874 }
0x15e8   :  { %v1886_v35 = vadd.f32 1.0, %v2875_v34  ;;  %v2877_v36 = vpop.eup %2876 }
0x15e9   :  { %v2004_v37 = vadd.f32 1.0, %v2877_v36 }
0x15ea   :  { %2878 = vrcp.f32 %v1886_v35 }
0x15eb   :  { %2880 = vrcp.f32 %v2004_v37 }
0x15f4   :  { %v2879_v30 = vpop.eup %2878 }
0x15f5   :  { %v2881_v39 = vpop.eup %2880  ;;  %v1890_v42 = vmul.f32 %v2879_v30, %v3483_v50 }
0x15f6   :  { %v2011_v48 = vmul.f32 %v2881_v39, %v2009_v47 }
0x164f   :  { %v1893_v38 = vpop.permute.xlu0 %1892 }
0x1650   :  { %v1895_v29 = vmul.f32 %v2879_v30, %v1893_v38 }
0x1652   :  { %1897 = vrot.lane.b32.xlu0 %v1895_v29, %s2980_s30 }
0x1659   :  { %v2014_v28 = vpop.permute.xlu1 %2013 }
0x165a   :  { %v2016_v40 = vmul.f32 %v2881_v39, %v2014_v28 }
0x165c   :  { %2018 = vrot.lane.b32.xlu1 %v2016_v40, %s2980_s30 }
0x16c4   :  { %v1898_v43 = vpop.permute.xlu0 %1897 }
0x16c5   :  { %v3549_v32 = vadd.f32 %v1898_v43, %v1890_v42 }
0x16c7   :  { %2882 = vtanh.f32 %v3549_v32 }
0x16ce   :  { %v2019_v49 = vpop.permute.xlu1 %2018 }
0x16cf   :  { %v3553_v56 = vadd.f32 %v2019_v49, %v2011_v48 }
0x16d1   :  { %v2883_v44 = vpop.eup %2882  ;;  %2884 = vtanh.f32 %v3553_v56 }
0x16d2   :  { %1903 = vrot.lane.b32.xlu0 %v2883_v44, %s2979_s27 }
0x16db   :  { %v2885_v61 = vpop.eup %2884 }
0x16dc   :  { %2024 = vrot.lane.b32.xlu1 %v2885_v61, %s2979_s27 }
0x1744   :  { %v1904_v50 = vpop.permute.xlu0 %1903 }
0x1745   :  { %v1906_v0 = vmul.f32 %v2879_v30, %v1904_v50 }
0x1747   :  { %v1907_v58 = vpack.c.bf16 %v1906_v0, %v1906_v0 }
0x1749   :  { %1909 = vrot.lane.b32.xlu0 %v1907_v58, %s2980_s30 }
0x174e   :  { %v2025_v41 = vpop.permute.xlu1 %2024 }
0x174f   :  { %v2027_v59 = vmul.f32 %v2881_v39, %v2025_v41 }
0x1751   :  { %v2028_v54 = vpack.c.bf16 %v2027_v59, %v2027_v59 }
0x1753   :  { %v2070_v1 = vrot.slane %v2028_v54, 3 }
0x1755   :  { %2071 = vrot.lane.b32.xlu1 %v2070_v1, %s2980_s30 }
0x17bb   :  { %v1910_v4 = vpop.permute.xlu0 %1909 }
0x17bc   :  { %2701 = vmatmul.mubr.msk.bf16.vlgmr.msra.gmra.mrb[52].mxu0 %vm197_vm4, %v1910_v4 }
0x17bd   :  { %2713 = vmatpush3.bf16.msra.mxu0 %v3498_v6  ;;  %2716 = vmatprep.mubr.msk.bf16.mxu0 %vm2977_vm0, %v2976_v2  ;;  %v3581_v6 = vld [vmem:[%s3648_s8] ss:$0 sm:$0xff]  ;;  %s2982_s8 = smov [#allocation4]  }
0x17be   :  { %2714 = vmatprep.subr.bf16.mxu0 %v2976_v2 }
0x17c1   :  { %2715 = vmatpush3.bf16.msra.mxu0 %v3507_v7 }
0x17c2   :  { %2728 = vmatprep.subr.bf16.mxu0 %v2976_v2 }
0x17c4   :  { %2717 = vmatmul.mubr.msk.bf16.vlgmr.msra.gmra.mrb[56].mxu0 %vm197_vm4, %v1910_v4 }
0x17c5   :  { %2729 = vmatpush3.bf16.msra.mxu0 %v2902_v60  ;;  %2732 = vmatprep.mubr.msk.bf16.mxu0 %vm2977_vm0, %v2976_v2 }
0x17c6   :  { %2730 = vmatprep.subr.bf16.mxu0 %v2976_v2 }
0x17c7   :  { %v2072_v53 = vpop.permute.xlu1 %2071 }
0x17c8   :  { %2725 = vmatmul.mubr.msk.bf16.vlgmr.msra.gmra.mrb[68].mxu1 %vm197_vm4, %v2072_v53 }
0x17c9   :  { %2731 = vmatpush3.bf16.msra.mxu0 %v2903_v5 }
0x188f   :  { %v1948_v62 = vpop.f32.mrb[52].mxu0 }
0x1890   :  { %v1949_v7 = vadd.f32 %v3581_v6, %v1948_v62  ;;  %v2702_v8 = vpop.f32.mrb[53].mxu0 }
0x1891   :  { %v1951_v45 = vpop.f32.mrb[54].mxu0 }
0x1892   :  { %1955 = vst [vmem:[#allocation2 + $0xc] sm:$0x3] %v1949_v7  ;;  %v2703_v2 = vpop.f32.mrb[55].mxu0 }
0x1897   :  { %v2063_v46 = vpop.f32.mrb[56].mxu0 }
0x1898   :  { %v2718_v51 = vpop.f32.mrb[57].mxu0 }
0x1899   :  { %v2066_v52 = vpop.f32.mrb[58].mxu0 }
0x189a   :  { %v2719_v22 = vpop.f32.mrb[59].mxu0 }
0x189b   :  { %v2110_v25 = vpop.f32.mrb[68].mxu1 }
0x189c   :  { %v2111_v9 = vadd.f32 %v2110_v25, %v2063_v46  ;;  %v2726_v10 = vpop.f32.mrb[69].mxu1 }
0x189d   :  { %v2113_v11 = vpop.f32.mrb[70].mxu1 }
0x189e   :  { %v2116_v12 = vadd.f32 %v3539_v17, %v2111_v9  ;;  %v2727_v13 = vpop.f32.mrb[71].mxu1 }
0x18a0   :  { %2886 = vtanh.f32 %v2116_v12  ;;  %v2342_v55 = vmul.f32 -1.442695, %v2116_v12 }
0x18a2   :  { %2888 = vpow2.f32 %v2342_v55 }
0x18aa   :  { %v2887_v14 = vpop.eup %2886 }
0x18ab   :  { %2126 = vrot.lane.b32.xlu0 %v2887_v14, %s2979_s27 }
0x18ac   :  { %v2889_v15 = vpop.eup %2888 }
0x18ad   :  { %v2120_v16 = vadd.f32 1.0, %v2889_v15 }
0x18af   :  { %2890 = vrcp.f32 %v2120_v16 }
0x18b9   :  { %v2891_v18 = vpop.eup %2890 }
0x18ba   :  { %v2124_v57 = vmul.f32 %v2891_v18, %v3549_v32 }
0x191d   :  { %v2127_v63 = vpop.permute.xlu0 %2126 }
0x191e   :  { %v2129_v19 = vmul.f32 %v2891_v18, %v2127_v63 }
0x1920   :  { %2131 = vrot.lane.b32.xlu1 %v2129_v19, %s2980_s30 }
0x1992   :  { %v2132_v20 = vpop.permute.xlu1 %2131 }
0x1993   :  { %v2134_v21 = vadd.f32 %v2132_v20, %v2124_v57 }
0x1995   :  { %2892 = vtanh.f32 %v2134_v21 }
0x199f   :  { %v2893_v17 = vpop.eup %2892 }
0x19a0   :  { %2137 = vrot.lane.b32.xlu0 %v2893_v17, %s2979_s27  ;;  %s2231_s27 = sshll.u32 %s2982_s8, 4  ;;  %s2232_s27 = int_to_ptr.vmem [resolvable:$true] %s2231_s27 }
0x19a1   :  { %s2905_s0 = scalar_lea.vmem %s2232_s27, 64  ;;  %p2910_p1 = scmp.lt.s32.totalorder %s2232_s27, %s2232_s27 }
0x19a2   :  { %p2906_p0 = scmp.ne.s32.totalorder %s2232_s27, %s2905_s0  ;;  %p2911_p2 = scmp.lt.s32.totalorder %s2905_s0, %s2905_s0 }
0x19a4   :  { %2191 = vrot.lane.b32.xlu0 %v2027_v59, %s2980_s30  ;;  %p2912_p3 = por %p2911_p2, %p2910_p1 }
0x19a6   :  { %p2913_p4 = pnand %p2912_p3, %p2906_p0 }
0x19a8   :  { %2197 = vrot.lane.b32.xlu0 %v3553_v56, %s2981_s7 }
0x1a12   :  { %v2138_v23 = vpop.permute.xlu0 %2137 }
0x1a13   :  { %v2140_v24 = vmul.f32 %v2891_v18, %v2138_v23 }
0x1a15   :  { %v2141_v26 = vpack.c.bf16 %v2140_v24, %v2140_v24 }
0x1a16   :  { %v2192_v27 = vpop.permute.xlu0 %2191 }
0x1a17   :  { %2195 = vst.msk [vmem:[#allocation4 - $0x6] sm:$0xc0] %vm2194_vm5, %v2192_v27  ;;  %2143 = vrot.lane.b32.xlu1 %v2141_v26, %s2980_s30 }
0x1a1a   :  { %v2198_v31 = vpop.permute.xlu0 %2197 }
0x1a1b   :  { %2200 = vst.msk [vmem:[#allocation6 - $0x6] sm:$0xc0] %vm2194_vm5, %v2198_v31  ;;  %2202 = vrot.lane.b32.xlu1 %v2140_v24, %s2980_s30 }
0x1a1f   :  { %2209 = vrot.lane.b32.xlu1 %v2134_v21, %s2981_s7 }
0x1a89   :  { %v2144_v33 = vpop.permute.xlu1 %2143 }
0x1a8a   :  { %2733 = vmatmul.mubr.msk.bf16.vlgmr.msra.gmra.mrb[60].mxu0 %vm197_vm4, %v2144_v33 }
0x1a8d   :  { %v2203_v3 = vpop.permute.xlu1 %2202 }
0x1a8e   :  { %2207 = vst.msk [vmem:[#allocation4 + $0x2] sm:$0x3] %vm2206_vm6, %v2203_v3 }
0x1a91   :  { %v2210_v34 = vpop.permute.xlu1 %2209 }
0x1a92   :  { %2213 = vst.msk [vmem:[#allocation6 + $0x2] sm:$0x3] %vm2206_vm6, %v2210_v34 }
0x1a93   :  { %2916 = shalt.err (!%p2913_p4)
}
0x1a94   :  { %s2917_s12 = scalar_lea.hbm %s3650_s10, 64 }
0x1a95   :  { %p2918_p5 = scmp.ne.s32.totalorder %s3650_s10, %s2917_s12  ;;  %p2921_p6 = scmp.lt.u32.totalorder %s2917_s12, %s3650_s10 }
0x1a97   :  { %p2923_p7 = pnand %p2921_p6, %p2918_p5 }
0x1a99   :  { %2926 = shalt.err (!%p2923_p7)
}
0x1a9a   :  { %s2983_s17 = smov 2   ;;  %s2984_s5 = smov [#allocation6]  }
0x1a9b   :  { %2237 = dma.vmem_to_hbm [thread:$0]  %s2232_s27, 64, %s3650_s10, [#allocation5], %s2980_s30, %s2980_s30, %s2983_s17  }
0x1a9c   :  { %s2243_s3 = sshll.u32 %s2984_s5, 4  ;;  %s2244_s3 = int_to_ptr.vmem [resolvable:$true] %s2243_s3 }
0x1a9d   :  { %s2927_s20 = scalar_lea.vmem %s2244_s3, 64  ;;  %p2932_p9 = scmp.lt.s32.totalorder %s2244_s3, %s2244_s3 }
0x1a9e   :  { %p2928_p8 = scmp.ne.s32.totalorder %s2244_s3, %s2927_s20  ;;  %p2933_p10 = scmp.lt.s32.totalorder %s2927_s20, %s2927_s20 }
0x1aa0   :  { %p2934_p11 = por %p2933_p10, %p2932_p9 }
0x1aa2   :  { %p2935_p12 = pnand %p2934_p11, %p2928_p8 }
0x1aa4   :  { %2938 = shalt.err (!%p2935_p12)
}
0x1aa5   :  { %s2939_s22 = scalar_lea.hbm %s3651_s11, 64 }
0x1aa6   :  { %p2940_p13 = scmp.ne.s32.totalorder %s3651_s11, %s2939_s22  ;;  %p2943_p0 = scmp.lt.u32.totalorder %s2939_s22, %s3651_s11 }
0x1aa8   :  { %p2945_p1 = pnand %p2943_p0, %p2940_p13 }
0x1aaa   :  { %2948 = shalt.err (!%p2945_p1)
}
0x1aab   :  { %2249 = dma.vmem_to_hbm [thread:$0]  %s2244_s3, 64, %s3651_s11, [#allocation5], %s2980_s30, %s2980_s30, %s2983_s17  }
0x1aac   :  { %s2985_s25 = smov [#allocation2]  }
0x1aad   :  { %s2219_s26 = sshll.u32 %s2985_s25, 4  ;;  %s2220_s26 = int_to_ptr.vmem [resolvable:$true] %s2219_s26 }
0x1aae   :  { %s2949_s7 = scalar_lea.vmem %s2220_s26, 256  ;;  %p2954_p3 = scmp.lt.s32.totalorder %s2220_s26, %s2220_s26 }
0x1aaf   :  { %p2950_p2 = scmp.ne.s32.totalorder %s2220_s26, %s2949_s7  ;;  %p2955_p4 = scmp.lt.s32.totalorder %s2949_s7, %s2949_s7 }
0x1ab1   :  { %p2956_p5 = por %p2955_p4, %p2954_p3 }
0x1ab3   :  { %p2957_p6 = pnand %p2956_p5, %p2950_p2 }
0x1b5d   :  { %v2182_v35 = vpop.f32.mrb[60].mxu0 }
0x1b5e   :  { %v2183_v36 = vadd.f32 %v3581_v6, %v2182_v35  ;;  %v2734_v37 = vpop.f32.mrb[61].mxu0 }
0x1b5f   :  { %v2185_v30 = vpop.f32.mrb[62].mxu0 }
0x1b60   :  { %2189 = vst [vmem:[#allocation2 + $0xe] sm:$0x3] %v2183_v36  ;;  %v2735_v38 = vpop.f32.mrb[63].mxu0 }
0x1b61   :  { %2960 = shalt.err (!%p2957_p6)
}
0x1b62   :  { %s2961_s11 = scalar_lea.hbm %s3649_s9, 256 }
0x1b63   :  { %p2962_p7 = scmp.ne.s32.totalorder %s3649_s9, %s2961_s11  ;;  %p2965_p8 = scmp.lt.u32.totalorder %s2961_s11, %s3649_s9 }
0x1b65   :  { %p2967_p9 = pnand %p2965_p8, %p2962_p7 }
0x1b67   :  { %2970 = shalt.err (!%p2967_p9)
}
0x1b68   :  { %2225 = dma.vmem_to_hbm [thread:$0]  %s2220_s26, 256, %s3649_s9, [#allocation3], %s2980_s30, %s2980_s30, %s2983_s17  }
0x1b69   :  { %2971 = dma.done.wait [#allocation3], 256  }
0x1b6a   :  { %2972 = vsyncadd [#allocation3], 4294967040 }
0x1b6b   :  { %2973 = dma.done.wait [#allocation5], 128  }
0x1b6c   :  { %2974 = vsyncadd [#allocation5], 4294967168 }
0x1b6d   :  { %2259 = vsyncpa [#allocation3], 1 }
0x1b6e   :  { %2260 = vsyncpa [#allocation5], 1 }

</bundles_post_ra>
